<compile_context>
chip_gen: v6e
topology: v6e:2x2x1
jax: 0.10.0
libtpu: 0.0.40
codegen_flags: <defaults>
</compile_context>

<pallas_src>
import jax
import jax.numpy as jnp
import numpy as np
from jax.experimental import pallas as pl
from jax.experimental.pallas import tpu as pltpu

KH = KW = 3
BN_EPS = 1e-5
# MXU operand precision (accumulation is always f32). Set to jnp.float32 for
# strict f32 numerics; bf16 doubles MXU throughput on v6e/v7x.
CONV_OPERAND_DTYPE = jnp.bfloat16


def _conv3x3_band(src, w_ref, rows_out):
    """3x3 'SAME' convolution of a row band as a single MXU matmul.

    src:   (rows_out + 2, W, Cin) value; src[i] is the conv input row
           `first_output_row - 1 + i`; the caller supplies zero rows for the
           image-top/bottom padding.
    w_ref: (3*Cin, 3*Cout) ref packed as [dh*Cin + ci, dw*Cout + co]
           = w_hwio[dh, dw, ci, co]   (row taps along K, column taps along N).
    Returns the (rows_out, W, Cout) f32 conv output (zero padding on columns).
    """
    _, W, _ = src.shape
    c_out = w_ref.shape[1] // KW
    srcb = src.astype(CONV_OPERAND_DTYPE)

    # Row taps along K: lhs[j] = concat(in[j-1], in[j], in[j+1]); leading-dim
    # slices + lane-axis concat -> no data movement.
    lhs = jnp.concatenate(
        [srcb[0:rows_out], srcb[1:rows_out + 1], srcb[2:rows_out + 2]],
        axis=-1)
    m = rows_out * W
    lhs2 = lhs.reshape(m, lhs.shape[-1])          # free relabel (W sublane-aligned)

    # One matmul: (rows_out*W, 3*Cin) x (3*Cin, 3*Cout), f32 accumulation.
    p = jnp.dot(lhs2, w_ref[...], preferred_element_type=jnp.float32)

    # Column-tap recombination: output column w takes tap dw from input column
    # w + dw - 1, i.e. flat row r-1 / r / r+1 of the matmul result.
    left = p[:, 0 * c_out:1 * c_out]       # dw=0 -> needs flat row r-1
    center = p[:, 1 * c_out:2 * c_out]     # dw=1 -> flat row r
    right = p[:, 2 * c_out:3 * c_out]      # dw=2 -> needs flat row r+1
    zrow = jnp.zeros((1, c_out), jnp.float32)
    # +-1 sublane shifts (lower to XLU rotates); masks implement the
    # left/right zero padding and kill the image-row-wrap garbage.
    left_sh = jnp.concatenate([zrow, left[0:m - 1]], axis=0)    # [r] = left[r-1]
    right_sh = jnp.concatenate([right[1:m], zrow], axis=0)      # [r] = right[r+1]
    col = jax.lax.broadcasted_iota(jnp.int32, (m, 1), 0) % W
    out = center
    out = out + jnp.where(col == 0, 0.0, left_sh)
    out = out + jnp.where(col == W - 1, 0.0, right_sh)
    return out.reshape(rows_out, W, c_out)


def _basic_block_kernel(x_ref, w1_ref, b1_ref, w2_ref, b2_ref, o_ref, xpad_ref):
    _, H, W, cin = x_ref.shape
    _, Rb, _, cout = o_ref.shape
    b = pl.program_id(1)
    nb = pl.num_programs(1)

    # Stage the image once per (image, core) into a row-padded scratch in MXU
    # operand precision; rows [0,2) and [H+2,H+4) are the conv zero padding.
    # Guarded on the *band* index: with the batch axis "parallel" every core
    # still executes band 0 of each image it owns, so its scratch is refilled.
    @pl.when(b == 0)
    def _():
        zrows = jnp.zeros((2, W, cin), xpad_ref.dtype)
        xpad_ref[0:2] = zrows
        xpad_ref[H + 2:H + 4] = zrows
        xpad_ref[2:H + 2] = x_ref[0].astype(xpad_ref.dtype)

    r0 = pl.multiple_of(b * Rb, Rb)        # first output row of this band

    # ---- conv1 (BN1 folded: pre-scaled weights, bias here) + ReLU -----------
    # Computed for rows [r0-1, r0+Rb+1): conv2 needs a 1-row halo of `mid`.
    src1 = xpad_ref[pl.ds(r0, Rb + 4)]     # image rows [r0-2, r0+Rb+2), zero-padded
    mid = _conv3x3_band(src1, w1_ref, Rb + 2) + b1_ref[...]
    mid = jnp.maximum(mid, 0.0)
    # conv2's zero padding: halo rows of `mid` lying outside the image -> 0.
    top_keep = (b > 0).astype(mid.dtype)          # row 0 is image row r0-1
    bot_keep = (b < nb - 1).astype(mid.dtype)     # row Rb+1 is image row r0+Rb
    mid = jnp.concatenate(
        [mid[0:1] * top_keep, mid[1:Rb + 1], mid[Rb + 1:Rb + 2] * bot_keep],
        axis=0)

    # ---- conv2 (BN2 folded) + identity + ReLU --------------------------------
    out = _conv3x3_band(mid, w2_ref, Rb) + b2_ref[...]
    out = out + x_ref[0, pl.ds(r0, Rb)].astype(jnp.float32)   # exact f32 identity
    o_ref[...] = jnp.maximum(out, 0.0).reshape(1, Rb, W, cout).astype(o_ref.dtype)


def _pack_conv_weight(w_hwio, dtype):
    """(3,3,Cin,Cout) HWIO -> (3*Cin, 3*Cout): row taps along K, col taps along N."""
    kh, kw, ci, co = w_hwio.shape
    return jnp.transpose(w_hwio, (0, 2, 1, 3)).reshape(kh * ci, kw * co).astype(dtype)


def _fold_bn(params):
    """Inference-mode BatchNorm folded into per-channel weight scale + bias
    (exact in real arithmetic)."""
    s1 = params["gamma1"] * jax.lax.rsqrt(params["var1"] + BN_EPS)
    b1 = params["beta1"] - params["mean1"] * s1
    s2 = params["gamma2"] * jax.lax.rsqrt(params["var2"] + BN_EPS)
    b2 = params["beta2"] - params["mean2"] * s2
    return params["w1"] * s1, b1, params["w2"] * s2, b2


def basic_block_forward(x_nchw, params, *, band_rows=8):
    """Pallas implementation of BasicBlockCustom.forward (stride=1, no downsample)."""
    x = jnp.transpose(x_nchw, (0, 2, 3, 1))       # NCHW -> NHWC (layout boundary only)
    N, H, W, cin = x.shape
    cout = params["w1"].shape[-1]
    assert cin == cout, "identity add requires inplanes == planes when no downsample"

    Rb = band_rows if H % band_rows == 0 else H   # output rows per grid step
    nb = H // Rb

    w1s, b1, w2s, b2 = _fold_bn(params)
    cdt = CONV_OPERAND_DTYPE
    w1p = _pack_conv_weight(w1s, cdt)             # (3*Cin, 3*Cout)
    w2p = _pack_conv_weight(w2s, cdt)             # (3*Cout, 3*Cout)
    b1 = b1.reshape(1, cout).astype(jnp.float32)
    b2 = b2.reshape(1, cout).astype(jnp.float32)

    cost = pl.CostEstimate(
        flops=2 * 2 * N * H * W * KH * KW * cin * cout,       # two 3x3 convs
        transcendentals=0,
        bytes_accessed=(N * H * W * (cin + cout) * 4
                        + (w1p.size + w2p.size) * w1p.dtype.itemsize
                        + 2 * cout * 4))

    out = pl.pallas_call(
        _basic_block_kernel,
        out_shape=jax.ShapeDtypeStruct((N, H, W, cout), x.dtype),
        grid_spec=pltpu.PrefetchScalarGridSpec(
            num_scalar_prefetch=0,
            grid=(N, nb),                          # (image, row band)
            in_specs=[
                # whole image, resident across the band axis (constant block idx)
                pl.BlockSpec((1, H, W, cin), lambda n, b: (n, 0, 0, 0)),
                # packed weights / biases: constant index -> fetched once per core
                pl.BlockSpec((KH * cin, KW * cout), lambda n, b: (0, 0)),
                pl.BlockSpec((1, cout), lambda n, b: (0, 0)),
                pl.BlockSpec((KH * cout, KW * cout), lambda n, b: (0, 0)),
                pl.BlockSpec((1, cout), lambda n, b: (0, 0)),
            ],
            out_specs=pl.BlockSpec((1, Rb, W, cout), lambda n, b: (n, b, 0, 0)),
            scratch_shapes=[
                pltpu.VMEM((H + 4, W, cin), cdt),  # row-padded resident image
            ],
        ),
        compiler_params=pltpu.CompilerParams(
            dimension_semantics=("parallel", "arbitrary"),
            vmem_limit_bytes=32 * 1024 * 1024),
        cost_estimate=cost,
    )(x, w1p, b1, w2p, b2)
    return jnp.transpose(out, (0, 3, 1, 2))        # NHWC -> NCHW


def reference_forward(x_nchw, params):
    """Plain-JAX reference (PyTorch eval-mode forward).  BatchNorm is folded
    into the conv weights exactly as in the kernel wrapper (exact in real
    arithmetic), and conv operands use the same precision the kernel feeds
    the MXU; accumulation is f32."""
    x = jnp.transpose(x_nchw, (0, 2, 3, 1))
    cdt = CONV_OPERAND_DTYPE
    w1s, b1, w2s, b2 = _fold_bn(params)

    def conv(v, w):
        return jax.lax.conv_general_dilated(
            v.astype(cdt), w.astype(cdt), window_strides=(1, 1), padding="SAME",
            dimension_numbers=("NHWC", "HWIO", "NHWC"),
            preferred_element_type=jnp.float32)

    out = jnp.maximum(conv(x, w1s) + b1, 0.0)
    out = jnp.maximum(conv(out, w2s) + b2 + x, 0.0)
    return jnp.transpose(out, (0, 3, 1, 2))


def make_params(key, inplanes, planes):
    ks = jax.random.split(key, 8)
    return {
        "w1": 0.1 * jax.random.normal(ks[0], (KH, KW, inplanes, planes), jnp.float32),
        "w2": 0.1 * jax.random.normal(ks[1], (KH, KW, planes, planes), jnp.float32),
        "gamma1": 1.0 + 0.1 * jax.random.normal(ks[2], (planes,), jnp.float32),
        "beta1": 0.1 * jax.random.normal(ks[3], (planes,), jnp.float32),
        "mean1": 0.1 * jax.random.normal(ks[4], (planes,), jnp.float32),
        "var1": 1.0 + 0.1 * jax.random.uniform(ks[5], (planes,), jnp.float32),
        "gamma2": 1.0 + 0.1 * jax.random.normal(ks[6], (planes,), jnp.float32),
        "beta2": 0.1 * jax.random.normal(ks[7], (planes,), jnp.float32),
        "mean2": 0.1 * jax.random.normal(ks[2], (planes,), jnp.float32),
        "var2": 1.0 + 0.1 * jax.random.uniform(ks[3], (planes,), jnp.float32),
    }


if __name__ == "__main__":
    key = jax.random.PRNGKey(0)
    k_x, k_p = jax.random.split(key)

    # ResNet-18/34 layer2-style BasicBlock: inplanes = planes = 128, stride = 1.
    # 128 channels keeps every lane dimension a dense, full 128-wide vreg row;
    # 4 images x 2 row bands = 8 grid steps (>= 4 per TensorCore on v7x).
    N, C, H, W = 4, 128, 16, 16
    x = jax.random.normal(k_x, (N, C, H, W), jnp.float32)
    params = make_params(k_p, C, C)

    out = jax.block_until_ready(basic_block_forward(x, params))
    ref = jax.block_until_ready(reference_forward(x, params))

    np.testing.assert_allclose(np.asarray(out), np.asarray(ref),
                               rtol=1e-2, atol=1e-2)
    print("KERNEL_OK")
</pallas_src>

<mosaic_0001>
module attributes {stable_mosaic.version = 11 : i64} {
  func.func @_basic_block_kernel(%arg0: i32, %arg1: i32, %arg2: memref<1x16x16x128xf32, #tpu.memory_space<vmem>>, %arg3: memref<384x384xbf16, #tpu.memory_space<vmem>>, %arg4: memref<1x128xf32, #tpu.memory_space<vmem>>, %arg5: memref<384x384xbf16, #tpu.memory_space<vmem>>, %arg6: memref<1x128xf32, #tpu.memory_space<vmem>>, %arg7: memref<1x8x16x128xf32, #tpu.memory_space<vmem>>, %arg8: memref<20x16x128xbf16, #tpu.memory_space<vmem>>) attributes {dimension_semantics = [#tpu.dimension_semantics<parallel>, #tpu.dimension_semantics<arbitrary>], iteration_bounds = array<i64: 4, 2>, scalar_prefetch = 0 : i64, scratch_operands = 1 : i64, tpu.core_type = #tpu.core_type<tc>, window_params = [{transform_indices = @transform_0, window_bounds = array<i64: 1, 16, 16, 128>}, {pipeline_mode = #tpu.pipeline_mode<synchronous>, transform_indices = @transform_1, window_bounds = array<i64: 384, 384>}, {pipeline_mode = #tpu.pipeline_mode<synchronous>, transform_indices = @transform_2, window_bounds = array<i64: 1, 128>}, {pipeline_mode = #tpu.pipeline_mode<synchronous>, transform_indices = @transform_3, window_bounds = array<i64: 384, 384>}, {pipeline_mode = #tpu.pipeline_mode<synchronous>, transform_indices = @transform_4, window_bounds = array<i64: 1, 128>}, {transform_indices = @transform_5, window_bounds = array<i64: 1, 8, 16, 128>}]} {
    %c0_i32 = arith.constant 0 : i32
    %0 = arith.cmpi eq, %arg1, %c0_i32 : i32
    %1 = arith.extui %0 : i1 to i32
    %c0_i32_0 = arith.constant 0 : i32
    %2 = arith.cmpi ne, %1, %c0_i32_0 : i32
    scf.if %2 {
      %cst_41 = arith.constant 0.000000e+00 : bf16
      %134 = vector.broadcast %cst_41 : bf16 to vector<2x16x128xbf16>
      %c0_42 = arith.constant 0 : index
      %c0_43 = arith.constant 0 : index
      %c0_44 = arith.constant 0 : index
      %135 = vector.load %arg8[%c0_42, %c0_43, %c0_44] : memref<20x16x128xbf16, #tpu.memory_space<vmem>>, vector<2x16x128xbf16>
      tpu.vector_store %arg8[%c0_42, %c0_43, %c0_44], %134 {strides = array<i32>} : memref<20x16x128xbf16, #tpu.memory_space<vmem>>, vector<2x16x128xbf16>,
      %c18 = arith.constant 18 : index
      %c0_45 = arith.constant 0 : index
      %c0_46 = arith.constant 0 : index
      %136 = vector.load %arg8[%c18, %c0_45, %c0_46] : memref<20x16x128xbf16, #tpu.memory_space<vmem>>, vector<2x16x128xbf16>
      tpu.vector_store %arg8[%c18, %c0_45, %c0_46], %134 {strides = array<i32>} : memref<20x16x128xbf16, #tpu.memory_space<vmem>>, vector<2x16x128xbf16>,
      %c0_47 = arith.constant 0 : index
      %c0_48 = arith.constant 0 : index
      %c0_49 = arith.constant 0 : index
      %c0_50 = arith.constant 0 : index
      %137 = vector.load %arg2[%c0_47, %c0_48, %c0_49, %c0_50] : memref<1x16x16x128xf32, #tpu.memory_space<vmem>>, vector<1x16x16x128xf32>
      %138 = vector.shape_cast %137 : vector<1x16x16x128xf32> to vector<16x16x128xf32>
      %139 = arith.truncf %138 : vector<16x16x128xf32> to vector<16x16x128xbf16>
      %c2 = arith.constant 2 : index
      %c0_51 = arith.constant 0 : index
      %c0_52 = arith.constant 0 : index
      %140 = vector.load %arg8[%c2, %c0_51, %c0_52] : memref<20x16x128xbf16, #tpu.memory_space<vmem>>, vector<16x16x128xbf16>
      tpu.vector_store %arg8[%c2, %c0_51, %c0_52], %139 {strides = array<i32>} : memref<20x16x128xbf16, #tpu.memory_space<vmem>>, vector<16x16x128xbf16>,
    } else {
    }
    %c8_i32 = arith.constant 8 : i32
    %3 = arith.muli %arg1, %c8_i32 : i32
    %4 = tpu.assume_multiple %3, 8 : i32
    %5 = arith.index_cast %4 : i32 to index
    %c0 = arith.constant 0 : index
    %c0_1 = arith.constant 0 : index
    %6 = vector.load %arg8[%5, %c0, %c0_1] : memref<20x16x128xbf16, #tpu.memory_space<vmem>>, vector<12x16x128xbf16>
    %7 = vector.extract_strided_slice %6 {offsets = [0, 0, 0], sizes = [10, 16, 128], strides = [1, 1, 1]} : vector<12x16x128xbf16> to vector<10x16x128xbf16>
    %8 = vector.extract_strided_slice %6 {offsets = [1, 0, 0], sizes = [10, 16, 128], strides = [1, 1, 1]} : vector<12x16x128xbf16> to vector<10x16x128xbf16>
    %9 = vector.extract_strided_slice %6 {offsets = [2, 0, 0], sizes = [10, 16, 128], strides = [1, 1, 1]} : vector<12x16x128xbf16> to vector<10x16x128xbf16>
    %10 = tpu.concatenate %7, %8, %9 in 2 : vector<10x16x128xbf16>, vector<10x16x128xbf16>, vector<10x16x128xbf16> -> vector<10x16x384xbf16>
    %11 = vector.shape_cast %10 : vector<10x16x384xbf16> to vector<160x384xbf16>
    %c0_2 = arith.constant 0 : index
    %c0_3 = arith.constant 0 : index
    %12 = vector.load %arg3[%c0_2, %c0_3] : memref<384x384xbf16, #tpu.memory_space<vmem>>, vector<384x384xbf16>
    %cst = arith.constant dense<0.000000e+00> : vector<160x384xf32>
    %13 = tpu.matmul %11, %12, %cst {dimension_numbers = #tpu.dot_dimension_numbers<[1], [0], [0], [1], [0, 0, 1, 1], [], []>} : vector<160x384xbf16>, vector<384x384xbf16>, vector<160x384xf32> -> vector<160x384xf32>
    %14 = vector.extract_strided_slice %13 {offsets = [0, 0], sizes = [160, 128], strides = [1, 1]} : vector<160x384xf32> to vector<160x128xf32>
    %15 = vector.extract_strided_slice %13 {offsets = [0, 128], sizes = [160, 128], strides = [1, 1]} : vector<160x384xf32> to vector<160x128xf32>
    %16 = vector.extract_strided_slice %13 {offsets = [0, 256], sizes = [160, 128], strides = [1, 1]} : vector<160x384xf32> to vector<160x128xf32>
    %cst_4 = arith.constant 0.000000e+00 : f32
    %17 = vector.broadcast %cst_4 : f32 to vector<1x128xf32>
    %18 = vector.extract_strided_slice %14 {offsets = [0, 0], sizes = [159, 128], strides = [1, 1]} : vector<160x128xf32> to vector<159x128xf32>
    %19 = tpu.concatenate %17, %18 in 0 : vector<1x128xf32>, vector<159x128xf32> -> vector<160x128xf32>
    %20 = vector.extract_strided_slice %16 {offsets = [1, 0], sizes = [159, 128], strides = [1, 1]} : vector<160x128xf32> to vector<159x128xf32>
    %21 = tpu.concatenate %20, %17 in 0 : vector<159x128xf32>, vector<1x128xf32> -> vector<160x128xf32>
    %22 = tpu.iota {dimensions = array<i32: 0>} : vector<160x1xi32>
    %c16_i32 = arith.constant 16 : i32
    %c0_i32_5 = arith.constant 0 : i32
    %23 = arith.cmpi eq, %c16_i32, %c0_i32_5 : i32
    %c1_i32 = arith.constant 1 : i32
    %24 = arith.select %23, %c1_i32, %c16_i32 : i32
    %25 = vector.broadcast %24 : i32 to vector<160x1xi32>
    %26 = arith.remsi %22, %25 : vector<160x1xi32>
    %c0_i32_6 = arith.constant 0 : i32
    %27 = vector.broadcast %c0_i32_6 : i32 to vector<160x1xi32>
    %28 = arith.cmpi ne, %26, %27 : vector<160x1xi32>
    %c0_i32_7 = arith.constant 0 : i32
    %29 = vector.broadcast %c0_i32_7 : i32 to vector<160x1xi32>
    %30 = arith.cmpi slt, %26, %29 : vector<160x1xi32>
    %c0_i32_8 = arith.constant 0 : i32
    %31 = arith.cmpi slt, %24, %c0_i32_8 : i32
    %32 = vector.broadcast %31 : i1 to vector<160x1xi1>
    %33 = vector.broadcast %32 : vector<160x1xi1> to vector<160x1xi1>
    %34 = arith.xori %30, %33 : vector<160x1xi1>
    %35 = arith.andi %34, %28 : vector<160x1xi1>
    %36 = vector.broadcast %24 : i32 to vector<160x1xi32>
    %37 = arith.addi %26, %36 : vector<160x1xi32>
    %38 = arith.select %35, %37, %26 : vector<160x1xi1>, vector<160x1xi32>
    %c0_i32_9 = arith.constant 0 : i32
    %39 = vector.broadcast %c0_i32_9 : i32 to vector<160x1xi32>
    %40 = arith.cmpi eq, %38, %39 : vector<160x1xi32>
    %cst_10 = arith.constant 0.000000e+00 : f32
    %41 = vector.shape_cast %40 : vector<160x1xi1> to vector<160x1xi1>
    %42 = vector.broadcast %41 : vector<160x1xi1> to vector<160x128xi1>
    %43 = vector.broadcast %cst_10 : f32 to vector<160x128xf32>
    %44 = arith.select %42, %43, %19 : vector<160x128xi1>, vector<160x128xf32>
    %45 = arith.addf %15, %44 : vector<160x128xf32>
    %c15_i32 = arith.constant 15 : i32
    %46 = vector.broadcast %c15_i32 : i32 to vector<160x1xi32>
    %47 = arith.cmpi eq, %38, %46 : vector<160x1xi32>
    %cst_11 = arith.constant 0.000000e+00 : f32
    %48 = vector.shape_cast %47 : vector<160x1xi1> to vector<160x1xi1>
    %49 = vector.broadcast %48 : vector<160x1xi1> to vector<160x128xi1>
    %50 = vector.broadcast %cst_11 : f32 to vector<160x128xf32>
    %51 = arith.select %49, %50, %21 : vector<160x128xi1>, vector<160x128xf32>
    %52 = arith.addf %45, %51 : vector<160x128xf32>
    %53 = vector.shape_cast %52 : vector<160x128xf32> to vector<10x16x128xf32>
    %c0_12 = arith.constant 0 : index
    %c0_13 = arith.constant 0 : index
    %54 = vector.load %arg4[%c0_12, %c0_13] : memref<1x128xf32, #tpu.memory_space<vmem>>, vector<1x128xf32>
    %55 = vector.shape_cast %54 : vector<1x128xf32> to vector<1x1x128xf32>
    %56 = vector.broadcast %55 : vector<1x1x128xf32> to vector<10x16x128xf32>
    %57 = arith.addf %53, %56 : vector<10x16x128xf32>
    %cst_14 = arith.constant 0.000000e+00 : f32
    %58 = vector.broadcast %cst_14 : f32 to vector<10x16x128xf32>
    %59 = arith.maximumf %57, %58 : vector<10x16x128xf32>
    %c0_i32_15 = arith.constant 0 : i32
    %60 = arith.cmpi sgt, %arg1, %c0_i32_15 : i32
    %61 = arith.extui %60 : i1 to i32
    %62 = arith.sitofp %61 : i32 to f32
    %c1_i32_16 = arith.constant 1 : i32
    %63 = arith.cmpi slt, %arg1, %c1_i32_16 : i32
    %64 = arith.extui %63 : i1 to i32
    %65 = arith.sitofp %64 : i32 to f32
    %66 = vector.extract_strided_slice %59 {offsets = [0, 0, 0], sizes = [1, 16, 128], strides = [1, 1, 1]} : vector<10x16x128xf32> to vector<1x16x128xf32>
    %67 = vector.broadcast %62 : f32 to vector<1x16x128xf32>
    %68 = arith.mulf %66, %67 : vector<1x16x128xf32>
    %69 = vector.extract_strided_slice %59 {offsets = [1, 0, 0], sizes = [8, 16, 128], strides = [1, 1, 1]} : vector<10x16x128xf32> to vector<8x16x128xf32>
    %70 = vector.extract_strided_slice %59 {offsets = [9, 0, 0], sizes = [1, 16, 128], strides = [1, 1, 1]} : vector<10x16x128xf32> to vector<1x16x128xf32>
    %71 = vector.broadcast %65 : f32 to vector<1x16x128xf32>
    %72 = arith.mulf %70, %71 : vector<1x16x128xf32>
    %73 = tpu.concatenate %68, %69, %72 in 0 : vector<1x16x128xf32>, vector<8x16x128xf32>, vector<1x16x128xf32> -> vector<10x16x128xf32>
    %74 = arith.truncf %73 : vector<10x16x128xf32> to vector<10x16x128xbf16>
    %75 = vector.extract_strided_slice %74 {offsets = [0, 0, 0], sizes = [8, 16, 128], strides = [1, 1, 1]} : vector<10x16x128xbf16> to vector<8x16x128xbf16>
    %76 = vector.extract_strided_slice %74 {offsets = [1, 0, 0], sizes = [8, 16, 128], strides = [1, 1, 1]} : vector<10x16x128xbf16> to vector<8x16x128xbf16>
    %77 = vector.extract_strided_slice %74 {offsets = [2, 0, 0], sizes = [8, 16, 128], strides = [1, 1, 1]} : vector<10x16x128xbf16> to vector<8x16x128xbf16>
    %78 = tpu.concatenate %75, %76, %77 in 2 : vector<8x16x128xbf16>, vector<8x16x128xbf16>, vector<8x16x128xbf16> -> vector<8x16x384xbf16>
    %79 = vector.shape_cast %78 : vector<8x16x384xbf16> to vector<128x384xbf16>
    %c0_17 = arith.constant 0 : index
    %c0_18 = arith.constant 0 : index
    %80 = vector.load %arg5[%c0_17, %c0_18] : memref<384x384xbf16, #tpu.memory_space<vmem>>, vector<384x384xbf16>
    %cst_19 = arith.constant dense<0.000000e+00> : vector<128x384xf32>
    %81 = tpu.matmul %79, %80, %cst_19 {dimension_numbers = #tpu.dot_dimension_numbers<[1], [0], [0], [1], [0, 0, 1, 1], [], []>} : vector<128x384xbf16>, vector<384x384xbf16>, vector<128x384xf32> -> vector<128x384xf32>
    %82 = vector.extract_strided_slice %81 {offsets = [0, 0], sizes = [128, 128], strides = [1, 1]} : vector<128x384xf32> to vector<128x128xf32>
    %83 = vector.extract_strided_slice %81 {offsets = [0, 128], sizes = [128, 128], strides = [1, 1]} : vector<128x384xf32> to vector<128x128xf32>
    %84 = vector.extract_strided_slice %81 {offsets = [0, 256], sizes = [128, 128], strides = [1, 1]} : vector<128x384xf32> to vector<128x128xf32>
    %cst_20 = arith.constant 0.000000e+00 : f32
    %85 = vector.broadcast %cst_20 : f32 to vector<1x128xf32>
    %86 = vector.extract_strided_slice %82 {offsets = [0, 0], sizes = [127, 128], strides = [1, 1]} : vector<128x128xf32> to vector<127x128xf32>
    %87 = tpu.concatenate %85, %86 in 0 : vector<1x128xf32>, vector<127x128xf32> -> vector<128x128xf32>
    %88 = vector.extract_strided_slice %84 {offsets = [1, 0], sizes = [127, 128], strides = [1, 1]} : vector<128x128xf32> to vector<127x128xf32>
    %89 = tpu.concatenate %88, %85 in 0 : vector<127x128xf32>, vector<1x128xf32> -> vector<128x128xf32>
    %90 = tpu.iota {dimensions = array<i32: 0>} : vector<128x1xi32>
    %c16_i32_21 = arith.constant 16 : i32
    %c0_i32_22 = arith.constant 0 : i32
    %91 = arith.cmpi eq, %c16_i32_21, %c0_i32_22 : i32
    %c1_i32_23 = arith.constant 1 : i32
    %92 = arith.select %91, %c1_i32_23, %c16_i32_21 : i32
    %93 = vector.broadcast %92 : i32 to vector<128x1xi32>
    %94 = arith.remsi %90, %93 : vector<128x1xi32>
    %c0_i32_24 = arith.constant 0 : i32
    %95 = vector.broadcast %c0_i32_24 : i32 to vector<128x1xi32>
    %96 = arith.cmpi ne, %94, %95 : vector<128x1xi32>
    %c0_i32_25 = arith.constant 0 : i32
    %97 = vector.broadcast %c0_i32_25 : i32 to vector<128x1xi32>
    %98 = arith.cmpi slt, %94, %97 : vector<128x1xi32>
    %c0_i32_26 = arith.constant 0 : i32
    %99 = arith.cmpi slt, %92, %c0_i32_26 : i32
    %100 = vector.broadcast %99 : i1 to vector<128x1xi1>
    %101 = vector.broadcast %100 : vector<128x1xi1> to vector<128x1xi1>
    %102 = arith.xori %98, %101 : vector<128x1xi1>
    %103 = arith.andi %102, %96 : vector<128x1xi1>
    %104 = vector.broadcast %92 : i32 to vector<128x1xi32>
    %105 = arith.addi %94, %104 : vector<128x1xi32>
    %106 = arith.select %103, %105, %94 : vector<128x1xi1>, vector<128x1xi32>
    %c0_i32_27 = arith.constant 0 : i32
    %107 = vector.broadcast %c0_i32_27 : i32 to vector<128x1xi32>
    %108 = arith.cmpi eq, %106, %107 : vector<128x1xi32>
    %cst_28 = arith.constant 0.000000e+00 : f32
    %109 = vector.shape_cast %108 : vector<128x1xi1> to vector<128x1xi1>
    %110 = vector.broadcast %109 : vector<128x1xi1> to vector<128x128xi1>
    %111 = vector.broadcast %cst_28 : f32 to vector<128x128xf32>
    %112 = arith.select %110, %111, %87 : vector<128x128xi1>, vector<128x128xf32>
    %113 = arith.addf %83, %112 : vector<128x128xf32>
    %c15_i32_29 = arith.constant 15 : i32
    %114 = vector.broadcast %c15_i32_29 : i32 to vector<128x1xi32>
    %115 = arith.cmpi eq, %106, %114 : vector<128x1xi32>
    %cst_30 = arith.constant 0.000000e+00 : f32
    %116 = vector.shape_cast %115 : vector<128x1xi1> to vector<128x1xi1>
    %117 = vector.broadcast %116 : vector<128x1xi1> to vector<128x128xi1>
    %118 = vector.broadcast %cst_30 : f32 to vector<128x128xf32>
    %119 = arith.select %117, %118, %89 : vector<128x128xi1>, vector<128x128xf32>
    %120 = arith.addf %113, %119 : vector<128x128xf32>
    %121 = vector.shape_cast %120 : vector<128x128xf32> to vector<8x16x128xf32>
    %c0_31 = arith.constant 0 : index
    %c0_32 = arith.constant 0 : index
    %122 = vector.load %arg6[%c0_31, %c0_32] : memref<1x128xf32, #tpu.memory_space<vmem>>, vector<1x128xf32>
    %123 = vector.shape_cast %122 : vector<1x128xf32> to vector<1x1x128xf32>
    %124 = vector.broadcast %123 : vector<1x1x128xf32> to vector<8x16x128xf32>
    %125 = arith.addf %121, %124 : vector<8x16x128xf32>
    %c0_33 = arith.constant 0 : index
    %126 = arith.index_cast %4 : i32 to index
    %c0_34 = arith.constant 0 : index
    %c0_35 = arith.constant 0 : index
    %127 = vector.load %arg2[%c0_33, %126, %c0_34, %c0_35] : memref<1x16x16x128xf32, #tpu.memory_space<vmem>>, vector<1x8x16x128xf32>
    %128 = vector.shape_cast %127 : vector<1x8x16x128xf32> to vector<8x16x128xf32>
    %129 = arith.addf %125, %128 : vector<8x16x128xf32>
    %cst_36 = arith.constant 0.000000e+00 : f32
    %130 = vector.broadcast %cst_36 : f32 to vector<8x16x128xf32>
    %131 = arith.maximumf %129, %130 : vector<8x16x128xf32>
    %132 = vector.shape_cast %131 : vector<8x16x128xf32> to vector<1x8x16x128xf32>
    %c0_37 = arith.constant 0 : index
    %c0_38 = arith.constant 0 : index
    %c0_39 = arith.constant 0 : index
    %c0_40 = arith.constant 0 : index
    %133 = vector.load %arg7[%c0_37, %c0_38, %c0_39, %c0_40] : memref<1x8x16x128xf32, #tpu.memory_space<vmem>>, vector<1x8x16x128xf32>
    tpu.vector_store %arg7[%c0_37, %c0_38, %c0_39, %c0_40], %132 {strides = array<i32>} : memref<1x8x16x128xf32, #tpu.memory_space<vmem>>, vector<1x8x16x128xf32>,
    return
  }
  func.func @transform_0(%arg0: i32, %arg1: i32) -> (i32, i32, i32, i32) {
    %c0_i32 = arith.constant 0 : i32
    %c0_i32_0 = arith.constant 0 : i32
    %c0_i32_1 = arith.constant 0 : i32
    %c0_i32_2 = arith.constant 0 : i32
    return %arg0, %c0_i32, %c0_i32_0, %c0_i32_1 : i32, i32, i32, i32
  }
  func.func @transform_1(%arg0: i32, %arg1: i32) -> (i32, i32) {
    %c0_i32 = arith.constant 0 : i32
    %c0_i32_0 = arith.constant 0 : i32
    %c0_i32_1 = arith.constant 0 : i32
    return %c0_i32, %c0_i32_0 : i32, i32
  }
  func.func @transform_2(%arg0: i32, %arg1: i32) -> (i32, i32) {
    %c0_i32 = arith.constant 0 : i32
    %c0_i32_0 = arith.constant 0 : i32
    %c0_i32_1 = arith.constant 0 : i32
    return %c0_i32, %c0_i32_0 : i32, i32
  }
  func.func @transform_3(%arg0: i32, %arg1: i32) -> (i32, i32) {
    %c0_i32 = arith.constant 0 : i32
    %c0_i32_0 = arith.constant 0 : i32
    %c0_i32_1 = arith.constant 0 : i32
    return %c0_i32, %c0_i32_0 : i32, i32
  }
  func.func @transform_4(%arg0: i32, %arg1: i32) -> (i32, i32) {
    %c0_i32 = arith.constant 0 : i32
    %c0_i32_0 = arith.constant 0 : i32
    %c0_i32_1 = arith.constant 0 : i32
    return %c0_i32, %c0_i32_0 : i32, i32
  }
  func.func @transform_5(%arg0: i32, %arg1: i32) -> (i32, i32, i32, i32) {
    %c0_i32 = arith.constant 0 : i32
    %c0_i32_0 = arith.constant 0 : i32
    %c0_i32_1 = arith.constant 0 : i32
    return %arg0, %arg1, %c0_i32, %c0_i32_0 : i32, i32, i32, i32
  }
}

</mosaic_0001>

<bundles_post_ra>
// kernel: tpu_custom_call.1
= control target key start
LH: loop header
LB: loop body
LE: loop exit
PB: predicated region body
PF: predicated region fallthrough
CT: control target
= control target key end

     0   :  { %s5800_s0 = inlined_call_operand.hbm [shape: f32[4,16,16,128], index: 0, kind: input, shape index: {}]   ;;  %s5801_s1 = inlined_call_operand.hbm [shape: bf16[384,384], index: 1, kind: input, shape index: {}]   ;;  %s5802_s2 = inlined_call_operand.vmem [shape: f32[1,128], index: 2, kind: input, shape index: {}]   ;;  %s5803_s3 = inlined_call_operand.hbm [shape: bf16[384,384], index: 3, kind: input, shape index: {}]   ;;  %s5804_s4 = inlined_call_operand.vmem [shape: f32[1,128], index: 4, kind: input, shape index: {}]   ;;  %s5805_s5 = inlined_call_operand.hbm [shape: f32[4,16,16,128], index: 5, kind: output, shape index: {}]  }
   0x1   :  { %5831 = sst [smem:[#allocation28_spill]] %s5801_s1 }
   0x2   :  { %5832 = sst [smem:[#allocation29_spill]] %s5803_s3 }
   0x3   :  { %5833 = sst [smem:[#allocation30_spill]] %s5805_s5 }
   0x4   :  { %10 = vsyncpa [#allocation4], 0 }
   0x5   :  { %12 = vsyncpa [#allocation4 + $0x1], 0 }
   0x6   :  { %13 = vsyncpa [#allocation7], 0 }
   0x7   :  { %14 = vsyncpa [#allocation5], 0 }
   0x8   :  { %16 = vsyncpa [#allocation5 + $0x1], 0  ;;  %s4739_s18 = smov 0   ;;  %s4741_s19 = smov 0  }
   0x9   :  { %s4743_s20 = smov 0   ;;  %s4745_s21 = smov 0  }
   0xa   :  { %s4747_s22 = smov 0   ;;  %s4749_s23 = smov 0  }
   0xb   :  { %s4751_s24 = smov 0   ;;  %s4753_s25 = smov 0  }
   0xc   :  { %s4755_s26 = smov 0   ;;  %s4757_s27 = smov 0  }
   0xd   :  { %s4759_s28 = smov 0  }
   0xe LB: > { %5834 = sst [smem:[#allocation13_spill]] %s4655_s18  ;;  %s3566_s29 = sadd.s32 4294967295, %s4695_s28   ;;  %s4695_s28 = sphi %s4759_s28, %s22_s28   ;;  %s4691_s27 = sphi %s4757_s27, %s5962_s27   ;;  %s4687_s26 = sphi %s4755_s26, %s5961_s26   ;;  %s4683_s25 = sphi %s4753_s25, %s5960_s25   ;;  %s4679_s24 = sphi %s4751_s24, %s5959_s24   ;;  %s4675_s23 = sphi %s4749_s23, %s5958_s23   ;;  %s4671_s22 = sphi %s4747_s22, %s5957_s22   ;;  %s4667_s21 = sphi %s4745_s21, %s5956_s21   ;;  %s4663_s20 = sphi %s4743_s20, %s5955_s20   ;;  %s4659_s19 = sphi %s4741_s19, %s5954_s19   ;;  %s4655_s18 = sphi %s4739_s18, %s5953_s18  }
   0xf   : > { %5835 = sst [smem:[#allocation14_spill]] %s4683_s25  ;;  %s3567_s30 = sadd.s32 4294967294, %s4695_s28  }
  0x10   : > { %5836 = sst [smem:[#allocation15_spill]] %s4687_s26  ;;  %p54_p0 = scmp.ne.s32.totalorder %s4671_s22, %s4667_s21 }
  0x11   : > { %p4795_p1 = scmp.eq.s32.totalorder %s3566_s29, 0  ;;  %p163_p2 = scmp.ne.s32.totalorder %s4663_s20, %s4659_s19 }
  0x12   : > { %p164_p4 = scmp.eq.s32.totalorder %s3566_s29, 7  ;;  %p169_p5 = scmp.ne.s32.totalorder %s4659_s19, %s4655_s18 }
  0x13   : > { %s5837_s6 = scalar_select %p4795_p1, 1, 0 }
  0x14   : > { %p4804_p3 = por %p4795_p1, %p54_p0  ;;  %p170_p6 = scmp.eq.s32.totalorder %s3567_s30, 7 }
  0x15   : > { %p4810_p7 = por %p164_p4, %p163_p2  ;;  %p3568_p8 = scmp.ge.s32.totalorder %s4695_s28, 1 }
  0x16   : > { %p4815_p9 = por %p170_p6, %p169_p5  ;;  %p177_p10 = scmp.lt.s32.totalorder %s4695_s28, 9 }
  0x17   : > { %s5839_s9 = scalar_select %p4810_p7, 1, 0 }
  0x18   : > { %s5841_s10 = scalar_select %p4815_p9, 1, 0 }
  0x19   : > { %5840 = sst [smem:[#allocation16_spill]] %s5839_s9  ;;  %p4820_p11 = pnand %p3568_p8, %p177_p10 }
  0x1a   : > { %5842 = sst [smem:[#allocation17_spill]] %s5841_s10  ;;  %s4697_s12 = smov [#allocation6]  }
  0x1b   : > { %s189_s13 = sshll.u32 %s4697_s12, 4  ;;  %p4168_p12 = pneg %p4820_p11  ;;  %s190_s13 = int_to_ptr.vmem [resolvable:$true] %s189_s13 }
  0x1c   : > { %s4698_s15 = smov [#allocation8]   ;;  %s4502_s17 = scalar_lea.vmem %s190_s13, 9216 }
  0x1d   : > { %p4828_p13 = pnand %p4168_p12, %p4795_p1  ;;  %s205_s16 = sshll.u32 %s4698_s15, 4  ;;  %s206_s16 = int_to_ptr.vmem [resolvable:$true] %s205_s16 }
  0x1e   : > { %p4503_p2 = scmp.ne.s32.totalorder %s190_s13, %s4502_s17  ;;  %p4510_p6 = scmp.lt.s32.totalorder %s190_s13, %s190_s13 }
  0x1f   : > { %p4493_p0 = pneg %p4828_p13  ;;  %p4511_p8 = scmp.lt.s32.totalorder %s4502_s17, %s4502_s17 }
  0x21   : > { %p4505_p4 = pnand %p4503_p2, %p4493_p0  ;;  %p4512_p10 = por %p4511_p8, %p4510_p6 }
  0x23   : > { %p4506_p5 = pneg %p4505_p4 }
  0x25   : > { %p4513_p12 = pnand %p4512_p10, %p4506_p5 }
  0x27   : > { %4516 = shalt.err (!%p4513_p12)
}
  0x28   : > { %s4699_s21 = smov 192   ;;  %s4700_s29 = smov 12  }
  0x29   : > { %s5845_s1 = sld [smem:[#allocation28_spill]]  ;;  %s4528_s15 = scalar_lea.vmem %s206_s16, 9216 }
  0x2a   : > { %p4529_p9 = scmp.ne.s32.totalorder %s206_s16, %s4528_s15  ;;  %p4536_p7 = scmp.lt.s32.totalorder %s206_s16, %s206_s16 }
  0x2b   : > { %p4537_p1 = scmp.lt.s32.totalorder %s4528_s15, %s4528_s15 }
  0x2c   : > { %p4531_p2 = pnand %p4529_p9, %p4493_p0 }
  0x2d   : > { %p4538_p6 = por %p4537_p1, %p4536_p7 }
  0x2e   : > { %p4532_p4 = pneg %p4531_p2 }
  0x2f   : > { %4171 = dma.hbm_to_vmem [thread:$0]  (!%p4828_p13), %s5845_s1, 9216, %s190_s13, [#allocation7], %s4699_s21, %s4699_s21, %s4700_s29  }
  0x30   : > { %p4539_p5 = pnand %p4538_p6, %p4532_p4 }
  0x32   : > { %4542 = shalt.err (!%p4539_p5)
}
  0x33   : > { %s5846_s3 = sld [smem:[#allocation29_spill]]  ;;  %s31_s13 = sadd.s32 1, %s4687_s26 }
  0x34   : > { %s34_s30 = sadd.s32 1, %s4691_s27  ;;  %p32_p1 = scmp.ge.s32.totalorder %s31_s13, 2 }
  0x35   : > { %s41_s14 = sadd.s32 1, %s4675_s23  ;;  %p48_p7 = scmp.ne.s32.totalorder %s4675_s23, %s4671_s22 }
  0x36   : > { %p49_p9 = scmp.eq.s32.totalorder %s4695_s28, 0  ;;  %s5964_s13 = smov (%p32_p1, %s31_s13), 0 }
  0x37   : > { %5847 = sst [smem:[#allocation18_spill]] %s5964_s13  ;;  %s5966_s30 = smov (!%p32_p1, %s34_s30), %s4691_s27 }
  0x38   : > { %p4859_p0 = por %p49_p9, %p48_p7  ;;  %s149_s12 = ssub.s32 %s4687_s26, %s5964_s13 }
  0x39   : > { %4174 = dma.hbm_to_vmem [thread:$0]  (!%p4828_p13), %s5846_s3, 9216, %s206_s16, [#allocation7], %s4699_s21, %s4699_s21, %s4700_s29  }
  0x3a   : > { %p36_p13 = scmp.ge.s32.totalorder %s5966_s30, 4  ;;  %p4185_p8 = scmp.lt.s32.totalorder %s4695_s28, 8 }
  0x3b   : > { %s222_s16 = sand.u32 1, %s4675_s23   ;;  %s3782_s21 = sshll.u32 %s4691_s27, 12 }
  0x3c   : > { %s5968_s30 = smov (%p36_p13, %s5966_s30), 0  ;;  %s3572_s29 = sshll.u32 %s222_s16, 8 }
  0x3d   : > { %s38_s15 = ssub.s32 %s4691_s27, %s5968_s30  ;;  %s232_s10 = scalar_lea.hbm %s5800_s0, %s3782_s21 }
  0x3e   : > { %p39_p10 = scmp.eq.s32.totalorder %s38_s15, 0  ;;  %s150_s17 = sor.u32 %s149_s12, %s38_s15 }
  0x3f   : > { %p151_p12 = scmp.eq.s32.totalorder %s150_s17, 0  ;;  %s5849_s13 = sadd.s32 1, %s4663_s20 }
  0x40   : > { %s4876_s18 = scalar_select %p39_p10, %s4675_s23, %s41_s14  }
  0x41   : > { %s4881_s26 = scalar_select %p151_p12, %s4663_s20, %s5849_s13  }
  0x42   : > { %s226_s5 = scalar_lea.vmem [#allocation3], %s3572_s29  ;;  %p4887_p2 = pnand %p4185_p8, %p4859_p0 }
  0x43   : > { %s233_s9 = sshll.u32 %s226_s5, 4  ;;  %s223_s12 = scalar_lea.sflag [#allocation4], %s222_s16  ;;  %s234_s9 = int_to_ptr.vmem [resolvable:$true] %s233_s9 }
  0x44   : > { %p4545_p4 = pneg %p4887_p2  ;;  %s4556_s1 = scalar_lea.vmem %s234_s9, 4096 }
  0x45   : > { %p4557_p6 = scmp.ne.s32.totalorder %s234_s9, %s4556_s1  ;;  %s4701_s3 = smov [#allocation3]  }
  0x46   : > { %s4561_s13 = sshll.u32 %s4701_s3, 4  ;;  %s4562_s13 = int_to_ptr.vmem [resolvable:$false] %s4561_s13 }
  0x47   : > { %p4559_p5 = pnand %p4557_p6, %p4545_p4  ;;  %s4563_s14 = scalar_lea.vmem %s4562_s13, 8192 }
  0x48   : > { %p4564_p7 = scmp.lt.s32.totalorder %s234_s9, %s4562_s13  ;;  %p4565_p9 = scmp.lt.s32.totalorder %s4563_s14, %s4556_s1 }
  0x49   : > { %p4560_p1 = pneg %p4559_p5 }
  0x4a   : > { %p4566_p13 = por %p4565_p9, %p4564_p7 }
  0x4c   : > { %p4567_p0 = pnand %p4566_p13, %p4560_p1 }
  0x4e   : > { %4570 = shalt.err (!%p4567_p0)
}
  0x4f   : > { %s4702_s5 = smov 128   ;;  %s4703_s7 = smov 8  }
  0x50   : > { %4178 = dma.hbm_to_vmem [thread:$0]  (!%p4887_p2), %s232_s10, 4096, %s234_s9, %s223_s12, %s4702_s5, %s4702_s5, %s4703_s7  }
  0x51   : > { %245 = sbr.rel (%p4820_p11) target bundleno = 832 (0x340), region = 40 }
  0x56   : > { %s247_s16 = sand.u32 1, %s4671_s22  }
  0x57   : > { %s3576_s21 = sshll.u32 %s247_s16, 8  ;;  %s248_s29 = scalar_lea.sflag [#allocation4], %s247_s16 }
  0x58   : > { %s4898_s15 = scalar_lea.vmem [#allocation3], %s3576_s21 }
  0x59   : > { %4642 = dma.done.wait (%p4804_p3), %s248_s29, 4096  }
  0x5a   : > { %4644 = vsyncadd (%p4804_p3), %s248_s29, 4294963200  ;;  %p5851_p8 = scmp.ne.s32.totalorder %s5837_s6, 0 }
  0x5c   : > { %4646 = dma.done.wait (%p5851_p8), [#allocation7], 18432  }
  0x5d   : > { %4648 = vsyncadd (%p5851_p8), [#allocation7], 4294948864  ;;  %s283_s25 = sand.u32 1, %s4659_s19   ;;  %p3580_p11 = scmp.ne.s32.totalorder %s4679_s24, 0 }
  0x5e   : > { %s3579_s9 = sshll.u32 %s283_s25, 7 }
  0x5f   : > { %s4911_s10 = scalar_lea.vmem [#allocation9], %s3579_s9  ;;  %291 = sbr.rel (%p3580_p11) target bundleno = 117 (0x75), region = 56 }
  0x64   : > { %v301_v0 = vld [vmem:[%s4898_s15] sm:$0xff]  ;;  %v302_v1 = vld [vmem:[%s4898_s15 + $0x8] sm:$0xff]  ;;  %v303_v2 = vld [vmem:[%s4898_s15 + $0x10] sm:$0xff]  ;;  %v4704_v3 = vmov 0  }
  0x65   : > { %292 = vst [vmem:[#allocation2] sm:$0xf] %v4704_v3  ;;  %293 = vst [vmem:[#allocation2 + $0x4] sm:$0xf] %v4704_v3  ;;  %v3822_v4 = vpack.c.bf16 %v302_v1, %v301_v0  ;;  %v304_v5 = vld [vmem:[%s4898_s15 + $0x18] sm:$0xff]  ;;  %v305_v6 = vld [vmem:[%s4898_s15 + $0x20] sm:$0xff] }
  0x66   : > { %294 = vst [vmem:[#allocation2 + $0x8] sm:$0xf] %v4704_v3  ;;  %295 = vst [vmem:[#allocation2 + $0xc] sm:$0xf] %v4704_v3  ;;  %v306_v7 = vld [vmem:[%s4898_s15 + $0x28] sm:$0xff]  ;;  %v3827_v8 = vpack.c.bf16 %v304_v5, %v303_v2  ;;  %v307_v10 = vld [vmem:[%s4898_s15 + $0x30] sm:$0xff] }
  0x67   : > { %297 = vst [vmem:[#allocation2 + $0x90] sm:$0xf] %v4704_v3  ;;  %298 = vst [vmem:[#allocation2 + $0x94] sm:$0xf] %v4704_v3  ;;  %v3832_v9 = vpack.c.bf16 %v306_v7, %v305_v6  ;;  %v308_v11 = vld [vmem:[%s4898_s15 + $0x38] sm:$0xff]  ;;  %v309_v12 = vld [vmem:[%s4898_s15 + $0x40] sm:$0xff] }
  0x68   : > { %299 = vst [vmem:[#allocation2 + $0x98] sm:$0xf] %v4704_v3  ;;  %300 = vst [vmem:[#allocation2 + $0x9c] sm:$0xf] %v4704_v3  ;;  %v3837_v13 = vpack.c.bf16 %v308_v11, %v307_v10  ;;  %v310_v14 = vld [vmem:[%s4898_s15 + $0x48] sm:$0xff]  ;;  %v311_v15 = vld [vmem:[%s4898_s15 + $0x50] sm:$0xff] }
  0x69   : > { %3823 = vst [vmem:[#allocation2 + $0x10] sm:$0xff] %v3822_v4   ;;  %v312_v16 = vld [vmem:[%s4898_s15 + $0x58] sm:$0xff]  ;;  %3899 = vst [vmem:[#allocation2 + $0x18] sm:$0xff] %v3827_v8   ;;  %v3842_v17 = vpack.c.bf16 %v310_v14, %v309_v12  ;;  %v313_v19 = vld [vmem:[%s4898_s15 + $0x60] sm:$0xff] }
  0x6a   : > { %3900 = vst [vmem:[#allocation2 + $0x20] sm:$0xff] %v3832_v9   ;;  %v3847_v18 = vpack.c.bf16 %v312_v16, %v311_v15  ;;  %v314_v20 = vld [vmem:[%s4898_s15 + $0x68] sm:$0xff]  ;;  %v315_v21 = vld [vmem:[%s4898_s15 + $0x70] sm:$0xff]  ;;  %3901 = vst [vmem:[#allocation2 + $0x28] sm:$0xff] %v3837_v13  }
  0x6b   : > { %v3852_v22 = vpack.c.bf16 %v314_v20, %v313_v19  ;;  %v316_v23 = vld [vmem:[%s4898_s15 + $0x78] sm:$0xff]  ;;  %v317_v24 = vld [vmem:[%s4898_s15 + $0x80] sm:$0xff]  ;;  %v318_v25 = vld [vmem:[%s4898_s15 + $0x88] sm:$0xff]  ;;  %3902 = vst [vmem:[#allocation2 + $0x30] sm:$0xff] %v3842_v17  }
  0x6c   : > { %3903 = vst [vmem:[#allocation2 + $0x38] sm:$0xff] %v3847_v18   ;;  %v3857_v26 = vpack.c.bf16 %v316_v23, %v315_v21  ;;  %v3862_v27 = vpack.c.bf16 %v318_v25, %v317_v24  ;;  %v319_v28 = vld [vmem:[%s4898_s15 + $0x90] sm:$0xff]  ;;  %v320_v29 = vld [vmem:[%s4898_s15 + $0x98] sm:$0xff]  ;;  %v321_v30 = vld [vmem:[%s4898_s15 + $0xa0] sm:$0xff] }
  0x6d   : > { %3904 = vst [vmem:[#allocation2 + $0x40] sm:$0xff] %v3852_v22   ;;  %v3867_v31 = vpack.c.bf16 %v320_v29, %v319_v28  ;;  %v322_v32 = vld [vmem:[%s4898_s15 + $0xa8] sm:$0xff]  ;;  %v323_v33 = vld [vmem:[%s4898_s15 + $0xb0] sm:$0xff]  ;;  %v324_v34 = vld [vmem:[%s4898_s15 + $0xb8] sm:$0xff] }
  0x6e   : > { %3905 = vst [vmem:[#allocation2 + $0x48] sm:$0xff] %v3857_v26   ;;  %3906 = vst [vmem:[#allocation2 + $0x50] sm:$0xff] %v3862_v27   ;;  %v3872_v35 = vpack.c.bf16 %v322_v32, %v321_v30  ;;  %v3877_v36 = vpack.c.bf16 %v324_v34, %v323_v33  ;;  %v325_v37 = vld [vmem:[%s4898_s15 + $0xc0] sm:$0xff]  ;;  %v326_v38 = vld [vmem:[%s4898_s15 + $0xc8] sm:$0xff] }
  0x6f   : > { %v327_v39 = vld [vmem:[%s4898_s15 + $0xd0] sm:$0xff]  ;;  %3907 = vst [vmem:[#allocation2 + $0x58] sm:$0xff] %v3867_v31   ;;  %v3882_v40 = vpack.c.bf16 %v326_v38, %v325_v37  ;;  %v328_v41 = vld [vmem:[%s4898_s15 + $0xd8] sm:$0xff]  ;;  %v329_v42 = vld [vmem:[%s4898_s15 + $0xe0] sm:$0xff] }
  0x70   : > { %v330_v43 = vld [vmem:[%s4898_s15 + $0xe8] sm:$0xff]  ;;  %3908 = vst [vmem:[#allocation2 + $0x60] sm:$0xff] %v3872_v35   ;;  %3909 = vst [vmem:[#allocation2 + $0x68] sm:$0xff] %v3877_v36   ;;  %v3887_v44 = vpack.c.bf16 %v328_v41, %v327_v39  ;;  %v331_v46 = vld [vmem:[%s4898_s15 + $0xf0] sm:$0xff] }
  0x71   : > { %v3892_v45 = vpack.c.bf16 %v330_v43, %v329_v42  ;;  %v332_v47 = vld [vmem:[%s4898_s15 + $0xf8] sm:$0xff]  ;;  %3910 = vst [vmem:[#allocation2 + $0x70] sm:$0xff] %v3882_v40  }
  0x72   : > { %v3897_v48 = vpack.c.bf16 %v332_v47, %v331_v46  ;;  %3911 = vst [vmem:[#allocation2 + $0x78] sm:$0xff] %v3887_v44  }
  0x73   : > { %3912 = vst [vmem:[#allocation2 + $0x80] sm:$0xff] %v3892_v45  }
  0x74   : > { %3913 = vst [vmem:[#allocation2 + $0x88] sm:$0xff] %v3897_v48  }
  0x75 PF: > { %v4287_v49 = vld [vmem:[#allocation6 + $0xac] ss:$12 sps:$4 sm:$0xff]   ;;  %v5816_v51 = vmov 0   ;;  %v4291_v52 = vld [vmem:[#allocation6 + $0xa8] ss:$12 sps:$4 sm:$0xff]   ;;  %s3816_s6 = sshll.u32 %s4679_s24, 6 }
  0x76   : > { %v4289_v50 = vld [vmem:[#allocation6 + $0x22c] ss:$12 sps:$4 sm:$0xff]   ;;  %1239 = vmatprep.mubr.bf16.mxu1 %v5816_v51  ;;  %1074 = vmatprep.subr.bf16.mxu0 %v4287_v49  ;;  %v4292_v53 = vld [vmem:[#allocation6 + $0x228] ss:$12 sps:$4 sm:$0xff]   ;;  %v4297_v56 = vld [vmem:[#allocation6 + $0x90] ss:$12 sps:$4 sm:$0xff]  }
  0x77   : > { %1207 = vmatprep.subr.bf16.mxu1 %v4289_v50  ;;  %v4293_v54 = vld [vmem:[#allocation6 + $0x94] ss:$12 sps:$4 sm:$0xff]   ;;  %1075 = vmatpush1.bf16.msra.mxu0 %v4291_v52  ;;  %v4298_v57 = vld [vmem:[#allocation6 + $0x210] ss:$12 sps:$4 sm:$0xff]   ;;  %v4303_v60 = vld [vmem:[#allocation6 + $0x78] ss:$12 sps:$4 sm:$0xff]  }
  0x78   : > { %1208 = vmatpush1.bf16.msra.mxu1 %v4292_v53  ;;  %v4295_v55 = vld [vmem:[#allocation6 + $0x214] ss:$12 sps:$4 sm:$0xff]   ;;  %1076 = vmatprep.subr.bf16.mxu0 %v4293_v54  ;;  %v4299_v58 = vld [vmem:[#allocation6 + $0x7c] ss:$12 sps:$4 sm:$0xff]   ;;  %v4304_v61 = vld [vmem:[#allocation6 + $0x1f8] ss:$12 sps:$4 sm:$0xff]  }
  0x79   : > { %1209 = vmatprep.subr.bf16.mxu1 %v4295_v55  ;;  %v4301_v59 = vld [vmem:[#allocation6 + $0x1fc] ss:$12 sps:$4 sm:$0xff]   ;;  %v4305_v62 = vld [vmem:[#allocation6 + $0x64] ss:$12 sps:$4 sm:$0xff]   ;;  %v4309_v0 = vld [vmem:[#allocation6 + $0x60] ss:$12 sps:$4 sm:$0xff]  }
  0x7a   : > { %v4307_v63 = vld [vmem:[#allocation6 + $0x1e4] ss:$12 sps:$4 sm:$0xff]   ;;  %v4310_v1 = vld [vmem:[#allocation6 + $0x1e0] ss:$12 sps:$4 sm:$0xff]   ;;  %v4315_v4 = vld [vmem:[#allocation6 + $0x48] ss:$12 sps:$4 sm:$0xff]  }
  0x7b   : > { %1077 = vmatpush1.bf16.msra.mxu0 %v4297_v56  ;;  %v4311_v2 = vld [vmem:[#allocation6 + $0x4c] ss:$12 sps:$4 sm:$0xff]   ;;  %v4316_v5 = vld [vmem:[#allocation6 + $0x1c8] ss:$12 sps:$4 sm:$0xff]   ;;  %v4321_v8 = vld [vmem:[#allocation6 + $0x30] ss:$12 sps:$4 sm:$0xff]  }
  0x7c   : > { %1210 = vmatpush1.bf16.msra.mxu1 %v4298_v57  ;;  %1078 = vmatprep.subr.bf16.mxu0 %v4299_v58  ;;  %v4313_v3 = vld [vmem:[#allocation6 + $0x1cc] ss:$12 sps:$4 sm:$0xff]   ;;  %v4317_v6 = vld [vmem:[#allocation6 + $0x34] ss:$12 sps:$4 sm:$0xff]   ;;  %v4322_v9 = vld [vmem:[#allocation6 + $0x1b0] ss:$12 sps:$4 sm:$0xff]  }
  0x7d   : > { %1211 = vmatprep.subr.bf16.mxu1 %v4301_v59  ;;  %v4319_v7 = vld [vmem:[#allocation6 + $0x1b4] ss:$12 sps:$4 sm:$0xff]   ;;  %v4323_v10 = vld [vmem:[#allocation6 + $0x1c] ss:$12 sps:$4 sm:$0xff]   ;;  %s4948_s8 = scalar_lea.vmem [#allocation2], %s3816_s6  ;;  %vm5826_vm0 = vcmask 1040384  }
  0x7e   : > { %v4325_v11 = vld [vmem:[#allocation6 + $0x19c] ss:$12 sps:$4 sm:$0xff]   ;;  %v4327_v12 = vld [vmem:[#allocation6 + $0x18] ss:$12 sps:$4 sm:$0xff]   ;;  %v4333_v16 = vld [vmem:[#allocation6] ss:$12 sps:$4 sm:$0xff]  }
  0x7f   : > { %1079 = vmatpush1.bf16.msra.mxu0 %v4303_v60  ;;  %v4328_v13 = vld [vmem:[#allocation6 + $0x198] ss:$12 sps:$4 sm:$0xff]   ;;  %v4334_v17 = vld [vmem:[#allocation6 + $0x180] ss:$12 sps:$4 sm:$0xff]   ;;  %v4951_v19 = vld [vmem:[%s4948_s8 + $0x10] sm:$0xff]   ;;  %p2236_p3 = scmp.gt.s32.totalorder %s4679_s24, 0 }
  0x80   : > { %1212 = vmatpush1.bf16.msra.mxu1 %v4304_v61  ;;  %1080 = vmatprep.subr.bf16.mxu0 %v4305_v62  ;;  %v4329_v14 = vld [vmem:[#allocation6 + $0x4] ss:$12 sps:$4 sm:$0xff]   ;;  %v4335_v18 = vld [vmem:[#allocation6 + $0x16c] ss:$12 sps:$4 sm:$0xff]   ;;  %v4338_v20 = vld [vmem:[#allocation6 + $0x168] ss:$12 sps:$4 sm:$0xff]  }
  0x81   : > { %1213 = vmatprep.subr.bf16.mxu1 %v4307_v63  ;;  %v4331_v15 = vld [vmem:[#allocation6 + $0x184] ss:$12 sps:$4 sm:$0xff]   ;;  %v4339_v22 = vld [vmem:[#allocation6 + $0x154] ss:$12 sps:$4 sm:$0xff]   ;;  %v4342_v25 = vld [vmem:[#allocation6 + $0x13c] ss:$12 sps:$4 sm:$0xff]  }
  0x82   : > { %v4353_v21 = vld [vmem:[#allocation6 + $0x170] ss:$12 sps:$4 sm:$0xff]   ;;  %v4345_v27 = vld [vmem:[#allocation6 + $0x138] ss:$12 sps:$4 sm:$0xff]   ;;  %v4959_v30 = vld [vmem:[%s4948_s8 + $0x8] sm:$0xff]   ;;  %vm5827_vm11 = vcmask 1046528  }
  0x83   : > { %1081 = vmatpush1.bf16.msra.mxu0 %v4309_v0  ;;  %v4354_v23 = vld [vmem:[#allocation6 + $0xb0] ss:$12 sps:$4 sm:$0xff]   ;;  %v4364_v28 = vld [vmem:[#allocation6 + $0x158] ss:$12 sps:$4 sm:$0xff]   ;;  %v4348_v32 = vld [vmem:[#allocation6 + $0x120] ss:$12 sps:$4 sm:$0xff]   ;;  %1106 = vmatprep.mubr.bf16.mxu0 %v4959_v30 }
  0x84   : > { %1214 = vmatpush1.bf16.msra.mxu1 %v4310_v1  ;;  %1082 = vmatprep.subr.bf16.mxu0 %v4311_v2  ;;  %v4341_v24 = vld [vmem:[#allocation6 + $0x150] ss:$12 sps:$4 sm:$0xff]   ;;  %v4366_v29 = vld [vmem:[#allocation6 + $0x98] ss:$12 sps:$4 sm:$0xff]   ;;  %v4371_v34 = vld [vmem:[#allocation6 + $0x140] ss:$12 sps:$4 sm:$0xff]  }
  0x85   : > { %1215 = vmatprep.subr.bf16.mxu1 %v4313_v3  ;;  %v4956_v26 = vld [vmem:[%s4948_s8 + $0x18] sm:$0xff]   ;;  %v4346_v31 = vld [vmem:[#allocation6 + $0x124] ss:$12 sps:$4 sm:$0xff]   ;;  %v4372_v35 = vld [vmem:[#allocation6 + $0x80] ss:$12 sps:$4 sm:$0xff]   ;;  %p2239_p10 = scmp.lt.s32.totalorder %s4679_s24, 1 }
  0x86   : > { %v4349_v33 = vld [vmem:[#allocation6 + $0x10c] ss:$12 sps:$4 sm:$0xff]   ;;  %v4965_v36 = vld [vmem:[%s4948_s8 + $0x20] sm:$0xff]   ;;  %v4352_v37 = vld [vmem:[#allocation6 + $0x108] ss:$12 sps:$4 sm:$0xff]   ;;  %s3817_s14 = sshll.u32 %s4679_s24, 7 }
  0x87   : > { %1083 = vmatpush1.bf16.msra.mxu0 %v4315_v4  ;;  %v4355_v38 = vld [vmem:[#allocation6 + $0xf4] ss:$12 sps:$4 sm:$0xff]   ;;  %v4357_v41 = vld [vmem:[#allocation6 + $0xf0] ss:$12 sps:$4 sm:$0xff]   ;;  %v4970_v43 = vld [vmem:[%s4948_s8 + $0x28] sm:$0xff]   ;;  %s5625_s5 = scalar_lea.vmem %s4898_s15, %s3817_s14 [#allocation3]  ;;  %s5938_s21 = sld [smem:[#allocation14_spill]] }
  0x88   : > { %1216 = vmatpush1.bf16.msra.mxu1 %v4316_v5  ;;  %1084 = vmatprep.subr.bf16.mxu0 %v4317_v6  ;;  %v4376_v39 = vld [vmem:[#allocation6 + $0x128] ss:$12 sps:$4 sm:$0xff]   ;;  %v4380_v44 = vld [vmem:[#allocation6 + $0x110] ss:$12 sps:$4 sm:$0xff]   ;;  %v4361_v46 = vld [vmem:[#allocation6 + $0xd8] ss:$12 sps:$4 sm:$0xff]  }
  0x89   : > { %1217 = vmatprep.subr.bf16.mxu1 %v4319_v7  ;;  %v4377_v40 = vld [vmem:[#allocation6 + $0x68] ss:$12 sps:$4 sm:$0xff]   ;;  %v4381_v45 = vld [vmem:[#allocation6 + $0x50] ss:$12 sps:$4 sm:$0xff]   ;;  %v4384_v48 = vld [vmem:[#allocation6 + $0xf8] ss:$12 sps:$4 sm:$0xff]  }
  0x8a   : > { %v4358_v42 = vld [vmem:[#allocation6 + $0xdc] ss:$12 sps:$4 sm:$0xff]   ;;  %v4362_v47 = vld [vmem:[#allocation6 + $0xc4] ss:$12 sps:$4 sm:$0xff]   ;;  %v4365_v50 = vld [vmem:[#allocation6 + $0xc0] ss:$12 sps:$4 sm:$0xff]  }
  0x8b   : > { %1085 = vmatpush1.bf16.msra.mxu0 %v4321_v8  ;;  %v4385_v49 = vld [vmem:[#allocation6 + $0x38] ss:$12 sps:$4 sm:$0xff]   ;;  %v4387_v52 = vld [vmem:[#allocation6 + $0xe0] ss:$12 sps:$4 sm:$0xff]   ;;  %v4978_v54 = vld [vmem:[%s4948_s8 + $0x30] sm:$0xff]   ;;  %s3818_s29 = sshll.u32 %s4679_s24, 4 }
  0x8c   : > { %1218 = vmatpush1.bf16.msra.mxu1 %v4322_v9  ;;  %1086 = vmatprep.subr.bf16.mxu0 %v4323_v10  ;;  %v4975_v53 = vld [vmem:[%s4948_s8] sm:$0xff]   ;;  %v4370_v55 = vld [vmem:[#allocation6 + $0x230] ss:$12 sps:$4 sm:$0xff]   ;;  %v4390_v57 = vld [vmem:[#allocation6 + $0xc8] ss:$12 sps:$4 sm:$0xff]   ;;  %s5944_s24 = sld [smem:[#allocation16_spill]] }
  0x8d   : > { %1219 = vmatprep.subr.bf16.mxu1 %v4325_v11  ;;  %v4389_v56 = vld [vmem:[#allocation6 + $0x20] ss:$12 sps:$4 sm:$0xff]   ;;  %v4374_v58 = vld [vmem:[#allocation6 + $0x218] ss:$12 sps:$4 sm:$0xff]   ;;  %v4391_v59 = vld [vmem:[#allocation6 + $0x8] ss:$12 sps:$4 sm:$0xff]  }
  0x8e   : > { %v4378_v60 = vld [vmem:[#allocation6 + $0x200] ss:$12 sps:$4 sm:$0xff]   ;;  %v4985_v61 = vld [vmem:[%s4948_s8 + $0x38] sm:$0xff]   ;;  %v4382_v62 = vld [vmem:[#allocation6 + $0x1e8] ss:$12 sps:$4 sm:$0xff]   ;;  %s3778_s15 = sshll.u32 %s5938_s21, 5 }
  0x8f   : > { %1087 = vmatpush1.bf16.msra.mxu0 %v4327_v12  ;;  %v4388_v63 = vld [vmem:[#allocation6 + $0x1d0] ss:$12 sps:$4 sm:$0xff]   ;;  %v4992_v0 = vld [vmem:[%s4948_s8 + $0x40] sm:$0xff]   ;;  %v4999_v3 = vld [vmem:[%s4948_s8 + $0x48] sm:$0xff]   ;;  %s5292_s11 = scalar_select %p2236_p3, 1, 0 }
  0x90   : > { %1220 = vmatpush1.bf16.msra.mxu1 %v4328_v13  ;;  %1088 = vmatprep.subr.bf16.mxu0 %v4329_v14  ;;  %v4392_v1 = vld [vmem:[#allocation6 + $0x1b8] ss:$12 sps:$4 sm:$0xff]   ;;  %v4393_v2 = vld [vmem:[#allocation6 + $0x1a0] ss:$12 sps:$4 sm:$0xff]   ;;  %v4394_v4 = vld [vmem:[#allocation6 + $0x188] ss:$12 sps:$4 sm:$0xff]   ;;  %s3453_s9 = sadd.s32 %s3818_s29, %s3778_s15 }
  0x91   : > { %1221 = vmatprep.subr.bf16.mxu1 %v4331_v15  ;;  %v4383_v5 = vld [vmem:[%s4948_s8 + $0x50] sm:$0xff]   ;;  %v4386_v6 = vld [vmem:[%s4948_s8 + $0x58] sm:$0xff]   ;;  %v4404_v14 = vld [vmem:[#allocation8 + $0x60] ss:$12 sps:$4 sm:$0xff]   ;;  %s2238_s17 = scvt.s32.f32 %s5292_s11  ;;  %s3779_s6 = sshll.u32 %s3453_s9, 7 }
  0x92   : > { %v4397_v7 = vld [vmem:[#allocation8 + $0xac] ss:$12 sps:$4 sm:$0xff]   ;;  %v4395_v8 = vld [vmem:[#allocation8 + $0xa8] ss:$12 sps:$4 sm:$0xff]   ;;  %v4398_v10 = vld [vmem:[#allocation8 + $0x90] ss:$12 sps:$4 sm:$0xff]  }
  0x93   : > { %1089 = vmatpush1.bf16.msra.mxu0 %v4333_v16  ;;  %v4400_v9 = vld [vmem:[#allocation8 + $0x94] ss:$12 sps:$4 sm:$0xff]   ;;  %v4403_v11 = vld [vmem:[#allocation8 + $0x7c] ss:$12 sps:$4 sm:$0xff]   ;;  %v4401_v12 = vld [vmem:[#allocation8 + $0x78] ss:$12 sps:$4 sm:$0xff]  }
  0x94   : > { %1222 = vmatpush1.bf16.msra.mxu1 %v4334_v17  ;;  %1090 = vmatprep.subr.bf16.mxu0 %v4335_v18  ;;  %v4406_v13 = vld [vmem:[#allocation8 + $0x64] ss:$12 sps:$4 sm:$0xff]   ;;  %v4409_v15 = vld [vmem:[#allocation8 + $0x4c] ss:$12 sps:$4 sm:$0xff]   ;;  %v4407_v16 = vld [vmem:[#allocation8 + $0x48] ss:$12 sps:$4 sm:$0xff]  }
  0x95   : > { %3914 = vmatprep.subr.bf16.mxu1 %v4353_v21  ;;  %v4412_v17 = vld [vmem:[#allocation8 + $0x34] ss:$12 sps:$4 sm:$0xff]   ;;  %v4410_v18 = vld [vmem:[#allocation8 + $0x30] ss:$12 sps:$4 sm:$0xff]   ;;  %s5503_s3 = scalar_select %p2239_p10, 1, 0 }
  0x96   : > { %v4421_v21 = vld [vmem:[#allocation8 + $0x4] ss:$12 sps:$4 sm:$0xff]   ;;  %s3456_s8 = sshll.u32 %s4911_s10, 4  ;;  %s5945_s12 = sld [smem:[#allocation30_spill]]  ;;  %s5734_s8 = int_to_ptr.vmem [resolvable:$true] %s3456_s8 }
  0x97   : > { %1240 = vmatmul.mubr.bf16.vlgmr.msra.gmra.mxu1 %v4951_v19  ;;  %1091 = vmatpush2.bf16.msra.mxu0 %v4338_v20  ;;  %v4413_v20 = vld [vmem:[#allocation8 + $0x18] ss:$12 sps:$4 sm:$0xff]   ;;  %s2241_s13 = scvt.s32.f32 %s5503_s3  ;;  %s5740_s3 = scalar_lea.sflag [#allocation5], %s283_s25 }
  0x98   : > { %1249 = vmatprep.mubr.bf16.mxu1 %v5816_v51  ;;  %1092 = vmatprep.subr.bf16.mxu0 %v4339_v22  ;;  %v4419_v22 = vld [vmem:[#allocation8] ss:$12 sps:$4 sm:$0xff]   ;;  %p5946_p2 = scmp.ne.s32.totalorder %s5944_s24, 0  ;;  %s4706_s14 = smov [#allocation9]  }
  0x99   : > { %3915 = vmatpush3.bf16.msra.mxu1 %v4354_v23  ;;  %v4416_v23 = vld [vmem:[#allocation8 + $0x228] ss:$12 sps:$4 sm:$0xff]  }
  0x9a   : > { %3916 = vmatprep.subr.bf16.mxu1 %v4364_v28  ;;  %v4428_v28 = vld [vmem:[#allocation8 + $0x150] ss:$12 sps:$4 sm:$0xff]  }
  0x9b   : > { %1093 = vmatpush2.bf16.msra.mxu0 %v4341_v24  ;;  %v4418_v24 = vld [vmem:[#allocation8 + $0x22c] ss:$12 sps:$4 sm:$0xff]  }
  0x9c   : > { %1094 = vmatprep.subr.bf16.mxu0 %v4342_v25  ;;  %v4424_v25 = vld [vmem:[#allocation8 + $0x16c] ss:$12 sps:$4 sm:$0xff]   ;;  %s5732_s1 = scalar_lea.hbm %s5945_s12, %s3779_s6 }
  0x9d   : > { %3917 = vmatpush3.bf16.msra.mxu1 %v4366_v29  ;;  %v4425_v29 = vld [vmem:[#allocation8 + $0x210] ss:$12 sps:$4 sm:$0xff]  }
  0x9e   : > { %3918 = vmatprep.subr.bf16.mxu1 %v4371_v34  ;;  %v4433_v34 = vld [vmem:[#allocation8 + $0x1fc] ss:$12 sps:$4 sm:$0xff]  }
  0x9f   : > { %1250 = vmatmul.mubr.bf16.gmra.mxu1 %v4956_v26  ;;  %1095 = vmatpush2.bf16.msra.mxu0 %v4345_v27  ;;  %v4430_v27 = vld [vmem:[#allocation8 + $0x154] ss:$12 sps:$4 sm:$0xff]  }
  0xa0   : > { %1259 = vmatprep.mubr.bf16.mxu1 %v5816_v51  ;;  %1096 = vmatprep.subr.bf16.mxu0 %v4346_v31  ;;  %v4436_v31 = vld [vmem:[#allocation8 + $0x13c] ss:$12 sps:$4 sm:$0xff]  }
  0xa1   : > { %3919 = vmatpush3.bf16.msra.mxu1 %v4372_v35  ;;  %v4442_v35 = vld [vmem:[#allocation8 + $0x124] ss:$12 sps:$4 sm:$0xff]  }
  0xa2   : > { %3920 = vmatprep.subr.bf16.mxu1 %v4376_v39  ;;  %v4448_v39 = vld [vmem:[#allocation8 + $0x10c] ss:$12 sps:$4 sm:$0xff]  }
  0xa3   : > { %1097 = vmatpush2.bf16.msra.mxu0 %v4348_v32  ;;  %v4434_v32 = vld [vmem:[#allocation8 + $0x138] ss:$12 sps:$4 sm:$0xff]  }
  0xa4   : > { %1098 = vmatprep.subr.bf16.mxu0 %v4349_v33  ;;  %v4431_v33 = vld [vmem:[#allocation8 + $0x1f8] ss:$12 sps:$4 sm:$0xff]  }
  0xa5   : > { %3921 = vmatpush3.bf16.msra.mxu1 %v4377_v40  ;;  %v4446_v40 = vld [vmem:[#allocation8 + $0x108] ss:$12 sps:$4 sm:$0xff]  }
  0xa6   : > { %3922 = vmatprep.subr.bf16.mxu1 %v4380_v44  ;;  %v4449_v44 = vld [vmem:[#allocation8 + $0xf0] ss:$12 sps:$4 sm:$0xff]  }
  0xa7   : > { %1260 = vmatmul.mubr.bf16.gmra.mxu1 %v4965_v36  ;;  %1099 = vmatpush2.bf16.msra.mxu0 %v4352_v37  ;;  %v4439_v37 = vld [vmem:[#allocation8 + $0x1e4] ss:$12 sps:$4 sm:$0xff]  }
  0xa8   : > { %1269 = vmatprep.mubr.bf16.mxu1 %v5816_v51  ;;  %1100 = vmatprep.subr.bf16.mxu0 %v4355_v38  ;;  %v4437_v38 = vld [vmem:[#allocation8 + $0x1e0] ss:$12 sps:$4 sm:$0xff]  }
  0xa9   : > { %3923 = vmatpush3.bf16.msra.mxu1 %v4381_v45 }
  0xaa   : > { %3924 = vmatprep.subr.bf16.mxu1 %v4384_v48 }
  0xab   : > { %1101 = vmatpush2.bf16.msra.mxu0 %v4357_v41  ;;  %v4445_v41 = vld [vmem:[#allocation8 + $0x1cc] ss:$12 sps:$4 sm:$0xff]  }
  0xac   : > { %1102 = vmatprep.subr.bf16.mxu0 %v4358_v42  ;;  %v4443_v42 = vld [vmem:[#allocation8 + $0x1c8] ss:$12 sps:$4 sm:$0xff]  }
  0xad   : > { %3925 = vmatpush3.bf16.msra.mxu1 %v4385_v49  ;;  %v4457_v49 = vld [vmem:[#allocation8 + $0xdc] ss:$12 sps:$4 sm:$0xff]  }
  0xae   : > { %3926 = vmatprep.subr.bf16.mxu1 %v4387_v52 }
  0xaf   : > { %1270 = vmatmul.mubr.bf16.gmra.mxu1 %v4970_v43  ;;  %1103 = vmatpush2.bf16.msra.mxu0 %v4361_v46  ;;  %v4454_v46 = vld [vmem:[#allocation8 + $0x1b4] ss:$12 sps:$4 sm:$0xff]  }
  0xb0   : > { %1279 = vmatprep.mubr.bf16.mxu1 %v5816_v51  ;;  %1104 = vmatprep.subr.bf16.mxu0 %v4362_v47  ;;  %v4452_v47 = vld [vmem:[#allocation8 + $0x1b0] ss:$12 sps:$4 sm:$0xff]  }
  0xb1   : > { %3927 = vmatpush3.bf16.msra.mxu1 %v4389_v56  ;;  %v4463_v56 = vld [vmem:[#allocation8 + $0xc4] ss:$12 sps:$4 sm:$0xff]  }
  0xb2   : > { %3928 = vmatprep.subr.bf16.mxu1 %v4390_v57  ;;  %v4461_v57 = vld [vmem:[#allocation8 + $0xc0] ss:$12 sps:$4 sm:$0xff]  }
  0xb3   : > { %1105 = vmatpush2.bf16.msra.mxu0 %v4365_v50  ;;  %v4455_v50 = vld [vmem:[#allocation8 + $0xd8] ss:$12 sps:$4 sm:$0xff]  }
  0xb4   : > { %4088 = vmatprep.subr.bf16.mxu0 %v4370_v55 }
  0xb5   : > { %3929 = vmatpush3.bf16.msra.mxu1 %v4391_v59  ;;  %v4466_v59 = vld [vmem:[#allocation8 + $0x184] ss:$12 sps:$4 sm:$0xff]  }
  0xb6   : > { %1107 = vmatmul.mubr.bf16.vlgmr.msra.gmra.mxu0 %v4975_v53  ;;  %2738 = vmatprep.subr.bf16.mxu1 %v4397_v7 }
  0xb7   : > { %1280 = vmatmul.mubr.bf16.gmra.mxu1 %v4978_v54  ;;  %4089 = vmatpush3.bf16.msra.mxu0 %v4370_v55  ;;  %v4458_v55 = vld [vmem:[#allocation8 + $0x198] ss:$12 sps:$4 sm:$0xff]  }
  0xb8   : > { %1116 = vmatprep.mubr.bf16.mxu0 %v4951_v19  ;;  %1289 = vmatprep.mubr.bf16.mxu1 %v5816_v51 }
  0xb9   : > { %4090 = vmatprep.subr.bf16.mxu0 %v4374_v58 }
  0xbb   : > { %4091 = vmatpush3.bf16.msra.mxu0 %v4374_v58 }
  0xbc   : > { %4092 = vmatprep.subr.bf16.mxu0 %v4378_v60 }
  0xbe   : > { %1117 = vmatmul.mubr.bf16.gmra.mxu0 %v4959_v30 }
  0xbf   : > { %1290 = vmatmul.mubr.bf16.gmra.mxu1 %v4985_v61  ;;  %1126 = vmatprep.mubr.bf16.mxu0 %v4956_v26 }
  0xc0   : > { %1299 = vmatprep.mubr.bf16.mxu1 %v5816_v51  ;;  %4093 = vmatpush3.bf16.msra.mxu0 %v4378_v60 }
  0xc1   : > { %4094 = vmatprep.subr.bf16.mxu0 %v4382_v62 }
  0xc4   : > { %4095 = vmatpush3.bf16.msra.mxu0 %v4382_v62 }
  0xc5   : > { %4096 = vmatprep.subr.bf16.mxu0 %v4388_v63 }
  0xc6   : > { %1127 = vmatmul.mubr.bf16.gmra.mxu0 %v4951_v19 }
  0xc7   : > { %1300 = vmatmul.mubr.bf16.gmra.mxu1 %v4992_v0  ;;  %1136 = vmatprep.mubr.bf16.mxu0 %v4965_v36 }
  0xc8   : > { %1309 = vmatprep.mubr.bf16.mxu1 %v5816_v51  ;;  %4097 = vmatpush3.bf16.msra.mxu0 %v4388_v63 }
  0xc9   : > { %4098 = vmatprep.subr.bf16.mxu0 %v4392_v1 }
  0xcc   : > { %4099 = vmatpush3.bf16.msra.mxu0 %v4392_v1 }
  0xcd   : > { %4100 = vmatprep.subr.bf16.mxu0 %v4393_v2 }
  0xce   : > { %1137 = vmatmul.mubr.bf16.gmra.mxu0 %v4956_v26 }
  0xcf   : > { %1310 = vmatmul.mubr.bf16.gmra.mxu1 %v4999_v3  ;;  %1146 = vmatprep.mubr.bf16.mxu0 %v4970_v43 }
  0xd0   : > { %1319 = vmatprep.mubr.bf16.mxu1 %v5816_v51  ;;  %4101 = vmatpush3.bf16.msra.mxu0 %v4393_v2 }
  0xd1   : > { %4102 = vmatprep.subr.bf16.mxu0 %v4394_v4 }
  0xd4   : > { %4103 = vmatpush3.bf16.msra.mxu0 %v4394_v4  ;;  %v1728_v4 = vlaneseq }
  0xd5   : > { %2851 = vmatprep.subr.bf16.mxu0 %v4418_v24 }
  0xd6   : > { %1147 = vmatmul.mubr.bf16.gmra.mxu0 %v4965_v36 }
  0xd7   : > { %1320 = vmatmul.mubr.bf16.gmra.mxu1 %v4383_v5  ;;  %1156 = vmatprep.mubr.bf16.mxu0 %v4978_v54 }
  0xd8   : > { %1329 = vmatprep.mubr.bf16.mxu1 %v5816_v51 }
  0xde   : > { %1157 = vmatmul.mubr.bf16.gmra.mxu0 %v4970_v43 }
  0xdf   : > { %1330 = vmatmul.mubr.bf16.gmra.mxu1 %v4386_v6  ;;  %1166 = vmatprep.mubr.bf16.mxu0 %v4985_v61 }
  0xe0   : > { %1372 = vmatprep.mubr.bf16.mxu1 %v4959_v30 }
  0xe6   : > { %1167 = vmatmul.mubr.bf16.gmra.mxu0 %v4978_v54 }
  0xe7   : > { %1373 = vmatmul.mubr.bf16.vlgmr.msra.gmra.mxu1 %v4975_v53  ;;  %1176 = vmatprep.mubr.bf16.mxu0 %v4992_v0  ;;  %v4460_v53 = vld [vmem:[#allocation8 + $0x19c] ss:$12 sps:$4 sm:$0xff]  }
  0xe8   : > { %1380 = vmatprep.mubr.bf16.mxu1 %v4951_v19  ;;  %2739 = vmatpush1.bf16.msra.mxu1 %v4395_v8  ;;  %v5058_v8 = vshrl.u32 %v1728_v4, 7 }
  0xe9   : > { %2740 = vmatprep.subr.bf16.mxu1 %v4400_v9 }
  0xea   : > { %v1735_v4 = vadd.s32 48, %v5058_v8 }
  0xec   : > { %2741 = vmatpush1.bf16.msra.mxu1 %v4398_v10 }
  0xed   : > { %2742 = vmatprep.subr.bf16.mxu1 %v4403_v11  ;;  %v1753_v11 = vand.u32 15, %v5058_v8 }
  0xee   : > { %1177 = vmatmul.mubr.bf16.gmra.mxu0 %v4985_v61 }
  0xef   : > { %1381 = vmatmul.mubr.bf16.gmra.mxu1 %v4959_v30  ;;  %1186 = vmatprep.mubr.bf16.mxu0 %v4999_v3  ;;  %v4427_v30 = vld [vmem:[#allocation8 + $0x214] ss:$12 sps:$4 sm:$0xff]   ;;  %vm5069_vm1 = vcmp.eq.s32.totalorder %v1753_v11, 0 }
  0xf0   : > { %1388 = vmatprep.mubr.bf16.mxu1 %v4956_v26  ;;  %2743 = vmatpush1.bf16.msra.mxu1 %v4401_v12 }
  0xf1   : > { %2744 = vmatprep.subr.bf16.mxu1 %v4406_v13 }
  0xf4   : > { %2745 = vmatpush1.bf16.msra.mxu1 %v4404_v14 }
  0xf5   : > { %2746 = vmatprep.subr.bf16.mxu1 %v4409_v15 }
  0xf6   : > { %1187 = vmatmul.mubr.bf16.gmra.mxu0 %v4992_v0 }
  0xf7   : > { %1389 = vmatmul.mubr.bf16.gmra.mxu1 %v4951_v19  ;;  %1196 = vmatprep.mubr.bf16.mxu0 %v4383_v5 }
  0xf8   : > { %1396 = vmatprep.mubr.bf16.mxu1 %v4965_v36  ;;  %2747 = vmatpush1.bf16.msra.mxu1 %v4407_v16 }
  0xf9   : > { %2748 = vmatprep.subr.bf16.mxu1 %v4412_v17 }
  0xfc   : > { %2749 = vmatpush1.bf16.msra.mxu1 %v4410_v18 }
  0xfe   : > { %1197 = vmatmul.mubr.bf16.gmra.mxu0 %v4999_v3 }
  0xff   : > { %1397 = vmatmul.mubr.bf16.gmra.mxu1 %v4956_v26  ;;  %4104 = vmatprep.mubr.bf16.mxu0 %v4951_v19  ;;  %v4415_v19 = vld [vmem:[#allocation8 + $0x1c] ss:$12 sps:$4 sm:$0xff]  }
 0x100   : > { %1404 = vmatprep.mubr.bf16.mxu1 %v4970_v43  ;;  %2750 = vmatprep.subr.bf16.mxu1 %v4415_v19  ;;  %v5852_v19 = vmov 0 }
 0x101   : > { %2751 = vmatpush1.bf16.msra.mxu1 %v4413_v20  ;;  %v5853_v19 = vsel %vm5069_vm1, 4294967295, %v5852_v19  ;;  %v1731_v20 = vadd.s32 16, %v5058_v8 }
 0x102   : > { %2752 = vmatprep.subr.bf16.mxu1 %v4421_v21  ;;  %5854 = vst [vmem:[#allocation19_spill] sm:$0xff] %v5853_v19 }
 0x105   : > { %2753 = vmatpush1.bf16.msra.mxu1 %v4419_v22 }
 0x106   : > { %4105 = vmatmul.mubr.bf16.vlgmr.msra.gmra.mxu0 %v4956_v26  ;;  %v4422_v26 = vld [vmem:[#allocation8 + $0x168] ss:$12 sps:$4 sm:$0xff]   ;;  %2754 = vmatprep.subr.bf16.mxu1 %v4424_v25 }
 0x107   : > { %1405 = vmatmul.mubr.bf16.gmra.mxu1 %v4965_v36  ;;  %4108 = vmatprep.mubr.bf16.mxu0 %v4965_v36  ;;  %v4440_v36 = vld [vmem:[#allocation8 + $0x120] ss:$12 sps:$4 sm:$0xff]  }
 0x108   : > { %1412 = vmatprep.mubr.bf16.mxu1 %v4978_v54  ;;  %2852 = vmatpush1.bf16.msra.mxu0 %v4416_v23 }
 0x109   : > { %2755 = vmatpush2.bf16.msra.mxu1 %v4422_v26  ;;  %2853 = vmatprep.subr.bf16.mxu0 %v4427_v30  ;;  %v1767_v30 = vand.u32 15, %v1731_v20  ;;  %v1795_v20 = vand.u32 15, %v1735_v4 }
 0x10a   : > { %2756 = vmatprep.subr.bf16.mxu1 %v4430_v27 }
 0x10b   : > { %vm5094_vm2 = vcmp.eq.s32.totalorder %v1767_v30, 0  ;;  %vm5144_vm4 = vcmp.eq.s32.totalorder %v1795_v20, 0 }
 0x10c   : > { %2854 = vmatpush1.bf16.msra.mxu0 %v4425_v29 }
 0x10d   : > { %2757 = vmatpush2.bf16.msra.mxu1 %v4428_v28  ;;  %2855 = vmatprep.subr.bf16.mxu0 %v4433_v34 }
 0x10e   : > { %4109 = vmatmul.mubr.bf16.gmra.mxu0 %v4970_v43  ;;  %2758 = vmatprep.subr.bf16.mxu1 %v4436_v31 }
 0x10f   : > { %1413 = vmatmul.mubr.bf16.gmra.mxu1 %v4970_v43  ;;  %4112 = vmatprep.mubr.bf16.mxu0 %v4978_v54  ;;  %v4451_v43 = vld [vmem:[#allocation8 + $0xf4] ss:$12 sps:$4 sm:$0xff]  }
 0x110   : > { %1420 = vmatprep.mubr.bf16.mxu1 %v4985_v61  ;;  %2856 = vmatpush1.bf16.msra.mxu0 %v4431_v33 }
 0x111   : > { %2759 = vmatpush2.bf16.msra.mxu1 %v4434_v32  ;;  %2857 = vmatprep.subr.bf16.mxu0 %v4439_v37  ;;  %v5092_v37 = vld [vmem:[#allocation8 + $0x230] ss:$12 sps:$4 sm:$0xff]  }
 0x112   : > { %2760 = vmatprep.subr.bf16.mxu1 %v4442_v35 }
 0x114   : > { %2858 = vmatpush1.bf16.msra.mxu0 %v4437_v38 }
 0x115   : > { %2761 = vmatpush2.bf16.msra.mxu1 %v4440_v36  ;;  %2859 = vmatprep.subr.bf16.mxu0 %v4445_v41  ;;  %v1733_v41 = vadd.s32 32, %v5058_v8 }
 0x116   : > { %4113 = vmatmul.mubr.bf16.gmra.mxu0 %v4985_v61  ;;  %2762 = vmatprep.subr.bf16.mxu1 %v4448_v39 }
 0x117   : > { %1421 = vmatmul.mubr.bf16.gmra.mxu1 %v4978_v54  ;;  %4116 = vmatprep.mubr.bf16.mxu0 %v4992_v0 }
 0x118   : > { %1428 = vmatprep.mubr.bf16.mxu1 %v4992_v0  ;;  %2860 = vmatpush1.bf16.msra.mxu0 %v4443_v42 }
 0x119   : > { %2763 = vmatpush2.bf16.msra.mxu1 %v4446_v40  ;;  %2861 = vmatprep.subr.bf16.mxu0 %v4454_v46  ;;  %v5855_v40 = vmov 0 }
 0x11a   : > { %2764 = vmatprep.subr.bf16.mxu1 %v4451_v43  ;;  %v5856_v40 = vsel %vm5094_vm2, 4294967295, %v5855_v40 }
 0x11b   : > { %5857 = vst [vmem:[#allocation20_spill] sm:$0xff] %v5856_v40 }
 0x11c   : > { %2862 = vmatpush1.bf16.msra.mxu0 %v4452_v47 }
 0x11d   : > { %2765 = vmatpush2.bf16.msra.mxu1 %v4449_v44  ;;  %2863 = vmatprep.subr.bf16.mxu0 %v4460_v53 }
 0x11e   : > { %4117 = vmatmul.mubr.bf16.gmra.mxu0 %v4999_v3  ;;  %2766 = vmatprep.subr.bf16.mxu1 %v4457_v49 }
 0x11f   : > { %1429 = vmatmul.mubr.bf16.gmra.mxu1 %v4985_v61  ;;  %4120 = vmatprep.mubr.bf16.mxu0 %v4383_v5  ;;  %v4464_v61 = vld [vmem:[#allocation8 + $0x180] ss:$12 sps:$4 sm:$0xff]  }
 0x120   : > { %1436 = vmatprep.mubr.bf16.mxu1 %v4999_v3  ;;  %2864 = vmatpush1.bf16.msra.mxu0 %v4458_v55 }
 0x121   : > { %2767 = vmatpush2.bf16.msra.mxu1 %v4455_v50  ;;  %2865 = vmatprep.subr.bf16.mxu0 %v4466_v59 }
 0x122   : > { %2768 = vmatprep.subr.bf16.mxu1 %v4463_v56 }
 0x124   : > { %2866 = vmatpush1.bf16.msra.mxu0 %v4464_v61 }
 0x125   : > { %2769 = vmatpush2.bf16.msra.mxu1 %v4461_v57 }
 0x126   : > { %4121 = vmatmul.mubr.bf16.gmra.mxu0 %v4386_v6  ;;  %v4467_v6 = vld [vmem:[#allocation8 + $0x170] ss:$12 sps:$4 sm:$0xff]   ;;  %4124 = vmatprep.subr.bf16.mxu1 %v5092_v37 }
 0x127   : > { %1437 = vmatmul.mubr.bf16.gmra.mxu1 %v4992_v0  ;;  %2883 = vmatprep.mubr.bf16.mxu0 %v5816_v51 }
 0x128   : > { %1444 = vmatprep.mubr.bf16.mxu1 %v4383_v5  ;;  %4008 = vmatprep.subr.bf16.mxu0 %v4467_v6 }
 0x12f   : > { %1445 = vmatmul.mubr.bf16.gmra.mxu1 %v4999_v3 }
 0x157   : > { %v1241_v45 = vpop.f32.mrf.mxu1 }
 0x159   : > { %v1243_v48 = vpop.f32.mrf.mxu1 }
 0x15b   : > { %v1245_v52 = vpop.f32.mrf.mxu1 }
 0x15d   : > { %v5046_v54 = vpop.f32.mrf.mxu1 }
 0x15f   : > { %v1251_v58 = vpop.f32.mrf.mxu1 }
 0x161   : > { %v1253_v60 = vpop.f32.mrf.mxu1 }
 0x163   : > { %v1255_v62 = vpop.f32.mrf.mxu1 }
 0x165   : > { %v5048_v63 = vpop.f32.mrf.mxu1 }
 0x167   : > { %v1261_v0 = vpop.f32.mrf.mxu1 }
 0x169   : > { %v1263_v1 = vpop.f32.mrf.mxu1 }
 0x16b   : > { %v5050_v2 = vpop.f32.mrf.mxu1 }
 0x16d   : > { %v5052_v3 = vpop.f32.mrf.mxu1 }
 0x16f   : > { %v5054_v5 = vpop.f32.mrf.mxu1 }
 0x171   : > { %v5056_v7 = vpop.f32.mrf.mxu1 }
 0x173   : > { %v5060_v9 = vpop.f32.mrf.mxu1 }
 0x175   : > { %v5062_v10 = vpop.f32.mrf.mxu1 }
 0x176   : > { %v1108_v12 = vpop.f32.mrf.mxu0 }
 0x177   : > { %v5065_v13 = vpop.f32.mrf.mxu1  ;;  %v1242_v14 = vadd.f32 %v1241_v45, %v1108_v12 }
 0x178   : > { %v1110_v15 = vpop.f32.mrf.mxu0 }
 0x179   : > { %v5067_v16 = vpop.f32.mrf.mxu1  ;;  %v1587_v17 = vrot.slane %v1242_v14, 7  ;;  %v1244_v18 = vadd.f32 %v1243_v48, %v1110_v15 }
 0x17a   : > { %v1112_v21 = vpop.f32.mrf.mxu0 }
 0x17b   : > { %v5074_v22 = vpop.f32.mrf.mxu1  ;;  %v1646_v23 = vsel %vm5826_vm0, 0.0, %v1587_v17  ;;  %v1246_v24 = vadd.f32 %v1245_v52, %v1112_v21  ;;  %v1781_v52 = vand.u32 15, %v1733_v41 }
 0x17c   : > { %v2049_v25 = vsel %vm5069_vm1, 0.0, %v1646_v23  ;;  %v5079_v26 = vpop.f32.mrf.mxu0 }
 0x17d   : > { %v5081_v27 = vpop.f32.mrf.mxu1  ;;  %v5083_v28 = vadd.f32 %v2049_v25, %v1244_v18  ;;  %v1588_v29 = vrot.slane %v1246_v24, 7  ;;  %vm5118_vm3 = vcmp.eq.s32.totalorder %v1781_v52, 0 }
 0x17e   : > { %v1118_v31 = vpop.f32.mrf.mxu0 }
 0x17f   : > { %v5085_v32 = vpop.f32.mrf.mxu1  ;;  %v5088_v33 = vsel %vm5826_vm0, %v1587_v17, %v1588_v29  ;;  %v1252_v34 = vadd.f32 %v1251_v58, %v1118_v31 }
 0x180   : > { %v1120_v35 = vpop.f32.mrf.mxu0 }
 0x181   : > { %v5090_v36 = vpop.f32.mrf.mxu1  ;;  %v1590_v38 = vrot.slane %v1252_v34, 7  ;;  %v1254_v39 = vadd.f32 %v1253_v60, %v1120_v35  ;;  %v5861_v34 = vmov 0  ;;  %v1737_v35 = vadd.s32 64, %v5058_v8 }
 0x182   : > { %v1122_v42 = vpop.f32.mrf.mxu0  ;;  %v5862_v34 = vsel %vm5144_vm4, 4294967295, %v5861_v34 }
 0x183   : > { %v5099_v43 = vpop.f32.mrf.mxu1  ;;  %v1591_v44 = vsel %vm5826_vm0, %v1588_v29, %v1590_v38  ;;  %v1256_v45 = vadd.f32 %v1255_v62, %v1122_v42  ;;  %v5858_v62 = vmov 0  ;;  %5863 = vst [vmem:[#allocation22_spill] sm:$0xff] %v5862_v34  ;;  %v1809_v52 = vand.u32 15, %v1737_v35 }
 0x184   : > { %v2051_v46 = vsel %vm5094_vm2, 0.0, %v1591_v44  ;;  %v5105_v47 = vpop.f32.mrf.mxu0  ;;  %v5859_v62 = vsel %vm5118_vm3, 4294967295, %v5858_v62 }
 0x185   : > { %v5107_v48 = vpop.f32.mrf.mxu1  ;;  %v5109_v49 = vadd.f32 %v2051_v46, %v1254_v39  ;;  %v1592_v50 = vrot.slane %v1256_v45, 7  ;;  %5860 = vst [vmem:[#allocation21_spill] sm:$0xff] %v5859_v62  ;;  %vm5169_vm5 = vcmp.eq.s32.totalorder %v1809_v52, 0 }
 0x186   : > { %v1128_v53 = vpop.f32.mrf.mxu0 }
 0x187   : > { %v5111_v55 = vpop.f32.mrf.mxu1  ;;  %v5114_v56 = vsel %vm5826_vm0, %v1590_v38, %v1592_v50  ;;  %v1262_v57 = vadd.f32 %v1261_v0, %v1128_v53 }
 0x188   : > { %v1130_v58 = vpop.f32.mrf.mxu0 }
 0x189   : > { %v5116_v59 = vpop.f32.mrf.mxu1  ;;  %v1594_v60 = vrot.slane %v1262_v57, 7  ;;  %v1264_v61 = vadd.f32 %v1263_v1, %v1130_v58 }
 0x18a   : > { %v1132_v6 = vpop.f32.mrf.mxu0 }
 0x18b   : > { %v5123_v11 = vpop.f32.mrf.mxu1  ;;  %v1595_v12 = vsel %vm5826_vm0, %v1592_v50, %v1594_v60  ;;  %v1266_v14 = vadd.f32 %v5050_v2, %v1132_v6 }
 0x18c   : > { %v2053_v0 = vsel %vm5118_vm3, 0.0, %v1595_v12  ;;  %v5129_v15 = vpop.f32.mrf.mxu0 }
 0x18d   : > { %v5131_v17 = vpop.f32.mrf.mxu1  ;;  %v5133_v1 = vadd.f32 %v2053_v0, %v1264_v61  ;;  %v1596_v18 = vrot.slane %v1266_v14, 7  ;;  %v5864_v14 = vmov 0 }
 0x18e   : > { %v1138_v21 = vpop.f32.mrf.mxu0  ;;  %v5865_v14 = vsel %vm5169_vm5, 4294967295, %v5864_v14 }
 0x18f   : > { %v5135_v23 = vpop.f32.mrf.mxu1  ;;  %v5138_v24 = vsel %vm5826_vm0, %v1594_v60, %v1596_v18  ;;  %v1272_v25 = vadd.f32 %v5054_v5, %v1138_v21  ;;  %5866 = vst [vmem:[#allocation23_spill] sm:$0xff] %v5865_v14 }
 0x190   : > { %v1140_v2 = vpop.f32.mrf.mxu0 }
 0x191   : > { %v5141_v29 = vpop.f32.mrf.mxu1  ;;  %v1598_v30 = vrot.slane %v1272_v25, 7  ;;  %v1274_v31 = vadd.f32 %v5056_v7, %v1140_v2 }
 0x192   : > { %v1142_v38 = vpop.f32.mrf.mxu0 }
 0x193   : > { %v5149_v39 = vpop.f32.mrf.mxu1  ;;  %v1599_v41 = vsel %vm5826_vm0, %v1596_v18, %v1598_v30  ;;  %v1276_v42 = vadd.f32 %v5060_v9, %v1142_v38 }
 0x194   : > { %v2055_v5 = vsel %vm5144_vm4, 0.0, %v1599_v41  ;;  %v1144_v44 = vpop.f32.mrf.mxu0 }
 0x195   : > { %v5155_v45 = vpop.f32.mrf.mxu1  ;;  %v5157_v7 = vadd.f32 %v2055_v5, %v1274_v31  ;;  %v1600_v46 = vrot.slane %v1276_v42, 7  ;;  %v1278_v50 = vadd.f32 %v5062_v10, %v1144_v44  ;;  %v1739_v10 = vadd.s32 80, %v5058_v8 }
 0x196   : > { %v1148_v53 = vpop.f32.mrf.mxu0 }
 0x197   : > { %v5160_v57 = vpop.f32.mrf.mxu1  ;;  %v1601_v58 = vsel %vm5826_vm0, %v1598_v30, %v1600_v46  ;;  %v1282_v60 = vadd.f32 %v5065_v13, %v1148_v53  ;;  %v1823_v35 = vand.u32 15, %v1739_v10  ;;  %v5867_v53 = vmov 0 }
 0x198   : > { %v5164_v9 = vadd.f32 %v1601_v58, %v1278_v50  ;;  %v1150_v61 = vpop.f32.mrf.mxu0 }
 0x199   : > { %v5166_v4 = vpop.f32.mrf.mxu1  ;;  %v1602_v6 = vrot.slane %v1282_v60, 7  ;;  %v1284_v12 = vadd.f32 %v5067_v16, %v1150_v61  ;;  %vm5194_vm6 = vcmp.eq.s32.totalorder %v1823_v35, 0 }
 0x19a   : > { %v1152_v0 = vpop.f32.mrf.mxu0  ;;  %v5868_v53 = vsel %vm5194_vm6, 4294967295, %v5867_v53 }
 0x19b   : > { %v5174_v18 = vpop.f32.mrf.mxu1  ;;  %v1603_v20 = vsel %vm5826_vm0, %v1600_v46, %v1602_v6  ;;  %v1286_v13 = vadd.f32 %v5074_v22, %v1152_v0  ;;  %5869 = vst [vmem:[#allocation24_spill] sm:$0xff] %v5868_v53 }
 0x19c   : > { %v2057_v21 = vsel %vm5169_vm5, 0.0, %v1603_v20  ;;  %v1154_v25 = vpop.f32.mrf.mxu0 }
 0x19d   : > { %v5180_v2 = vpop.f32.mrf.mxu1  ;;  %v5182_v16 = vadd.f32 %v2057_v21, %v1284_v12  ;;  %v1604_v30 = vrot.slane %v1286_v13, 7  ;;  %v1288_v31 = vadd.f32 %v5081_v27, %v1154_v25  ;;  %v1741_v27 = vadd.s32 96, %v5058_v8 }
 0x19e   : > { %v1158_v38 = vpop.f32.mrf.mxu0 }
 0x19f   : > { %v5185_v41 = vpop.f32.mrf.mxu1  ;;  %v1605_v42 = vsel %vm5826_vm0, %v1602_v6, %v1604_v30  ;;  %v1292_v5 = vadd.f32 %v5085_v32, %v1158_v38  ;;  %v1837_v13 = vand.u32 15, %v1741_v27 }
 0x1a0   : > { %v5189_v22 = vadd.f32 %v1605_v42, %v1288_v31  ;;  %v1160_v44 = vpop.f32.mrf.mxu0 }
 0x1a1   : > { %v5191_v46 = vpop.f32.mrf.mxu1  ;;  %v1606_v50 = vrot.slane %v1292_v5, 7  ;;  %v1294_v52 = vadd.f32 %v5090_v36, %v1160_v44  ;;  %vm5219_vm7 = vcmp.eq.s32.totalorder %v1837_v13, 0  ;;  %v5870_v44 = vmov 0 }
 0x1a2   : > { %v1162_v58 = vpop.f32.mrf.mxu0  ;;  %v5871_v44 = vsel %vm5219_vm7, 4294967295, %v5870_v44 }
 0x1a3   : > { %v5199_v60 = vpop.f32.mrf.mxu1  ;;  %v1607_v61 = vsel %vm5826_vm0, %v1604_v30, %v1606_v50  ;;  %v1296_v32 = vadd.f32 %v5099_v43, %v1162_v58  ;;  %5872 = vst [vmem:[#allocation25_spill] sm:$0xff] %v5871_v44 }
 0x1a4   : > { %v2059_v6 = vsel %vm5194_vm6, 0.0, %v1607_v61  ;;  %v1164_v12 = vpop.f32.mrf.mxu0 }
 0x1a5   : > { %v5205_v10 = vpop.f32.mrf.mxu1  ;;  %v5207_v36 = vadd.f32 %v2059_v6, %v1294_v52  ;;  %v1608_v0 = vrot.slane %v1296_v32, 7  ;;  %v1298_v20 = vadd.f32 %v5107_v48, %v1164_v12  ;;  %v1743_v48 = vadd.s32 112, %v5058_v8 }
 0x1a6   : > { %v1168_v21 = vpop.f32.mrf.mxu0 }
 0x1a7   : > { %v5210_v25 = vpop.f32.mrf.mxu1  ;;  %v1609_v31 = vsel %vm5826_vm0, %v1606_v50, %v1608_v0  ;;  %v1302_v30 = vadd.f32 %v5111_v55, %v1168_v21 }
 0x1a8   : > { %v5214_v43 = vadd.f32 %v1609_v31, %v1298_v20  ;;  %v1170_v35 = vpop.f32.mrf.mxu0  ;;  %v1851_v20 = vand.u32 15, %v1743_v48 }
 0x1a9   : > { %v5216_v38 = vpop.f32.mrf.mxu1  ;;  %v1610_v42 = vrot.slane %v1302_v30, 7  ;;  %v1304_v5 = vadd.f32 %v5116_v59, %v1170_v35 }
 0x1aa   : > { %v1172_v52 = vpop.f32.mrf.mxu0  ;;  %vm5244_vm8 = vcmp.eq.s32.totalorder %v1851_v20, 0 }
 0x1ab   : > { %v5224_v27 = vpop.f32.mrf.mxu1  ;;  %v1611_v50 = vsel %vm5826_vm0, %v1608_v0, %v1610_v42  ;;  %v1306_v55 = vadd.f32 %v5123_v11, %v1172_v52 }
 0x1ac   : > { %v2061_v58 = vsel %vm5219_vm7, 0.0, %v1611_v50  ;;  %v1174_v61 = vpop.f32.mrf.mxu0  ;;  %v5873_v50 = vmov 0 }
 0x1ad   : > { %v5230_v32 = vpop.f32.mrf.mxu1  ;;  %v5232_v59 = vadd.f32 %v2061_v58, %v1304_v5  ;;  %v1612_v6 = vrot.slane %v1306_v55, 7  ;;  %v1308_v12 = vadd.f32 %v5131_v17, %v1174_v61  ;;  %v5874_v50 = vsel %vm5244_vm8, 4294967295, %v5873_v50 }
 0x1ae   : > { %v1178_v13 = vpop.f32.mrf.mxu0  ;;  %5875 = vst [vmem:[#allocation26_spill] sm:$0xff] %v5874_v50  ;;  %v1745_v17 = vadd.s32 128, %v5058_v8 }
 0x1af   : > { %v5235_v21 = vpop.f32.mrf.mxu1  ;;  %v1613_v31 = vsel %vm5826_vm0, %v1610_v42, %v1612_v6  ;;  %v1312_v0 = vadd.f32 %v5135_v23, %v1178_v13 }
 0x1b0   : > { %v5239_v11 = vadd.f32 %v1613_v31, %v1308_v12  ;;  %v1180_v30 = vpop.f32.mrf.mxu0  ;;  %v1865_v31 = vand.u32 15, %v1745_v17 }
 0x1b1   : > { %v5241_v35 = vpop.f32.mrf.mxu1  ;;  %v1614_v52 = vrot.slane %v1312_v0, 7  ;;  %v1314_v5 = vadd.f32 %v5141_v29, %v1180_v30 }
 0x1b2   : > { %v1182_v48 = vpop.f32.mrf.mxu0  ;;  %vm2005_vm9 = vcmp.eq.s32.totalorder %v1865_v31, 0 }
 0x1b3   : > { %v5249_v55 = vpop.f32.mrf.mxu1  ;;  %v1615_v42 = vsel %vm5826_vm0, %v1612_v6, %v1614_v52  ;;  %v1316_v23 = vadd.f32 %v5149_v39, %v1182_v48 }
 0x1b4   : > { %v2063_v58 = vsel %vm5244_vm8, 0.0, %v1615_v42  ;;  %v1184_v61 = vpop.f32.mrf.mxu0 }
 0x1b5   : > { %v3940_v12 = vpop.f32.mrf.mxu1  ;;  %v5255_v13 = vadd.f32 %v2063_v58, %v1314_v5  ;;  %v1616_v29 = vrot.slane %v1316_v23, 7  ;;  %v1318_v20 = vadd.f32 %v5155_v45, %v1184_v61  ;;  %v1747_v23 = vadd.s32 144, %v5058_v8 }
 0x1b6   : > { %v1188_v0 = vpop.f32.mrf.mxu0 }
 0x1b7   : > { %v5258_v30 = vpop.f32.mrf.mxu1  ;;  %v1617_v51 = vsel %vm5826_vm0, %v1614_v52, %v1616_v29  ;;  %v1322_v6 = vadd.f32 %v5160_v57, %v1188_v0  ;;  %v1879_v31 = vand.u32 15, %v1747_v23 }
 0x1b8   : > { %v5262_v44 = vadd.f32 %v1617_v51, %v1318_v20  ;;  %v1190_v39 = vpop.f32.mrf.mxu0 }
 0x1b9   : > { %v5264_v48 = vpop.f32.mrf.mxu1  ;;  %v1618_v42 = vrot.slane %v1322_v6, 7  ;;  %v1324_v5 = vadd.f32 %v5166_v4, %v1190_v39  ;;  %vm2007_vm10 = vcmp.eq.s32.totalorder %v1879_v31, 0 }
 0x1ba   : > { %v1192_v45 = vpop.f32.mrf.mxu0 }
 0x1bb   : > { %v5268_v17 = vpop.f32.mrf.mxu1  ;;  %v1619_v58 = vsel %vm5826_vm0, %v1616_v29, %v1618_v42  ;;  %v1326_v52 = vadd.f32 %v5174_v18, %v1192_v45 }
 0x1bc   : > { %v2065_v61 = vsel %vm2005_vm9, 0.0, %v1619_v58  ;;  %v1194_v57 = vpop.f32.mrf.mxu0 }
 0x1bd   : > { %v5272_v51 = vpop.f32.mrf.mxu1  ;;  %v5274_v20 = vadd.f32 %v2065_v61, %v1324_v5  ;;  %v1620_v0 = vrot.slane %v1326_v52, 7  ;;  %v1328_v4 = vadd.f32 %v5180_v2, %v1194_v57 }
 0x1be   : > { %v1198_v6 = vpop.f32.mrf.mxu0 }
 0x1bf   : > { %v3948_v39 = vpop.f32.mrf.mxu1  ;;  %v1621_v50 = vsel %vm5826_vm0, %v1618_v42, %v1620_v0  ;;  %v1332_v53 = vadd.f32 %v5185_v41, %v1198_v6  ;;  %v1730_v41 = vadd.s32 8, %v5058_v8 }
 0x1c0   : > { %v5279_v29 = vadd.f32 %v1621_v50, %v1328_v4  ;;  %v1200_v18 = vpop.f32.mrf.mxu0  ;;  %v1732_v50 = vadd.s32 24, %v5058_v8 }
 0x1c1   : > { %v3949_v45 = vpop.f32.mrf.mxu1  ;;  %v1622_v58 = vrot.slane %v1332_v53, 7  ;;  %v1334_v14 = vadd.f32 %v5191_v46, %v1200_v18  ;;  %v1734_v18 = vadd.s32 40, %v5058_v8 }
 0x1c2   : > { %v1202_v5 = vpop.f32.mrf.mxu0 }
 0x1c3   : > { %v3951_v61 = vpop.f32.mrf.mxu1  ;;  %v1623_v2 = vsel %vm5826_vm0, %v1620_v0, %v1622_v58  ;;  %v1336_v23 = vadd.f32 %v5199_v60, %v1202_v5  ;;  %v3938_v60 = vadd.f32 %v5241_v35, %v5235_v21  ;;  %v1736_v35 = vadd.s32 56, %v5058_v8 }
 0x1c4   : > { %v2067_v52 = vsel %vm2007_vm10, 0.0, %v1623_v2  ;;  %v1204_v57 = vpop.f32.mrf.mxu0 }
 0x1c5   : > { %v3952_v42 = vpop.f32.mrf.mxu1  ;;  %v5287_v4 = vadd.f32 %v2067_v52, %v1334_v14  ;;  %v1624_v53 = vrot.slane %v1336_v23, 7  ;;  %v1338_v46 = vadd.f32 %v5205_v10, %v1204_v57  ;;  %v1760_v23 = vand.u32 15, %v1730_v41 }
 0x1c6   : > { %v4106_v6 = vpop.f32.mrf.mxu0  ;;  %v1774_v10 = vand.u32 15, %v1732_v50  ;;  %v3932_v52 = vadd.f32 %v5216_v38, %v5210_v25  ;;  %v3941_v57 = vadd.f32 %v3940_v12, %v5249_v55  ;;  %v3935_v41 = vadd.f32 %v5230_v32, %v5224_v27 }
 0x1c7   : > { %v5290_v31 = vpop.f32.mrf.mxu1  ;;  %v1625_v0 = vsel %vm5826_vm0, %v1622_v58, %v1624_v53  ;;  %v1496_v34 = vadd.f32 %v4106_v6, %v3938_v60  ;;  %v5310_v58 = vadd.s32 72, %v5058_v8  ;;  %v1248_v25 = vadd.f32 %v5046_v54, %v5079_v26 }
 0x1c8   : > { %v5298_v5 = vadd.f32 %v1625_v0, %v1338_v46  ;;  %v1487_v2 = vpop.f32.mrf.mxu0  ;;  %v1788_v46 = vand.u32 15, %v1734_v18  ;;  %vm5318_vm12 = vcmp.eq.s32.totalorder %v1760_v23, 15  ;;  %vm5322_vm13 = vcmp.eq.s32.totalorder %v1774_v10, 15 }
 0x1c9   : > { %v5300_v14 = vpop.f32.mrf.mxu1  ;;  %v1488_v50 = vadd.f32 %v3932_v52, %v1487_v2  ;;  %v5327_v60 = vadd.s32 88, %v5058_v8  ;;  %v3950_v27 = vadd.f32 %v3949_v45, %v3948_v39  ;;  %v1671_v32 = vrot.slane %v1496_v34, 1 }
 0x1ca   : > { %5876 = vst [vmem:[#allocation27_spill] sm:$0xff] %v5298_v5  ;;  %v4107_v21 = vpop.f32.mrf.mxu0  ;;  %v1258_v54 = vadd.f32 %v5048_v63, %v5105_v47  ;;  %v2242_v26 = vstv %s2238_s17  ;;  %v1802_v52 = vand.u32 15, %v1736_v35  ;;  %v3953_v10 = vadd.f32 %v3952_v42, %v3951_v61 }
 0x1cb   : > { %v5305_v62 = vpop.f32.mrf.mxu1  ;;  %v1499_v53 = vadd.f32 %v4107_v21, %v3941_v57  ;;  %v1816_v57 = vand.u32 15, %v5310_v58  ;;  %v1668_v21 = vrot.slane %v1488_v50, 1  ;;  %vm5333_vm14 = vcmp.eq.s32.totalorder %v1788_v46, 15 }
 0x1cc   : > { %v1490_v55 = vpop.f32.mrf.mxu0  ;;  %v1268_v34 = vadd.f32 %v5052_v3, %v5129_v15  ;;  %v3944_v63 = vadd.f32 %v5264_v48, %v5258_v30  ;;  %v1830_v45 = vand.u32 15, %v5327_v60  ;;  %v5343_v61 = vadd.s32 104, %v5058_v8  ;;  %v4468_v60 = vld [vmem:[#allocation8 + $0xb0] ss:$12 sps:$4 sm:$0xff]  }
 0x1cd   : > { %v5316_v38 = vpop.f32.mrf.mxu1  ;;  %v1673_v0 = vrot.slane %v1499_v53, 1  ;;  %v1491_v18 = vadd.f32 %v3935_v41, %v1490_v55  ;;  %v2070_v42 = vadd.f32 %v5088_v33, %v1248_v25  ;;  %v2072_v46 = vadd.f32 %v5114_v56, %v1258_v54 }
 0x1ce   : > { %v4110_v23 = vpop.f32.mrf.mxu0  ;;  %v3947_v33 = vadd.f32 %v5272_v51, %v5268_v17  ;;  %v3956_v56 = vadd.f32 %v5300_v14, %v5290_v31  ;;  %vm5365_vm15 = vcmp.eq.s32.totalorder %v1802_v52, 15  ;;  %vm5374_vm9 = vcmp.eq.s32.totalorder %v1816_v57, 15 }
 0x1cf   : > { %v3960_v2 = vpop.f32.mrf.mxu1  ;;  %v1674_v40 = vsel %vm5827_vm11, %v1671_v32, %v1673_v0  ;;  %v1669_v19 = vrot.slane %v1491_v18, 1  ;;  %v1512_v41 = vadd.f32 %v4110_v23, %v3950_v27  ;;  %vm5400_vm10 = vcmp.eq.s32.totalorder %v1830_v45, 15 }
 0x1d0   : > { %v1503_v39 = vpop.f32.mrf.mxu0  ;;  %v2171_v50 = vadd.f32 %v5109_v49, %v1674_v40  ;;  %v2074_v49 = vadd.f32 %v5138_v24, %v1268_v34 }
 0x1d1   : > { %v3961_v47 = vpop.f32.mrf.mxu1  ;;  %v1670_v35 = vsel %vm5827_vm11, %v1668_v21, %v1669_v19  ;;  %v1672_v58 = vsel %vm5827_vm11, %v1669_v19, %v1671_v32  ;;  %v1504_v30 = vadd.f32 %v3944_v63, %v1503_v39  ;;  %v5358_v19 = vld [vmem:[%s5802_s2] ss:$0 sm:$0xff]  ;;  %v1679_v21 = vrot.slane %v1512_v41, 1 }
 0x1d2   : > { %v2150_v3 = vsel %vm5318_vm12, 0.0, %v1672_v58  ;;  %v2169_v15 = vadd.f32 %v5083_v28, %v1670_v35  ;;  %v4111_v53 = vpop.f32.mrf.mxu0  ;;  %v3962_v28 = vadd.f32 %v3961_v47, %v3960_v2 }
 0x1d3   : > { %v3963_v48 = vpop.f32.mrf.mxu1  ;;  %v2170_v25 = vadd.f32 %v2150_v3, %v2070_v42  ;;  %v1515_v40 = vadd.f32 %v4111_v53, %v3953_v10  ;;  %v1675_v27 = vrot.slane %v1504_v30, 1  ;;  %v2198_v10 = vadd.f32 %v5358_v19, %v2171_v50 }
 0x1d4   : > { %v2196_v55 = vadd.f32 %v5358_v19, %v2169_v15  ;;  %v1506_v18 = vpop.f32.mrf.mxu0 }
 0x1d5   : > { %v3964_v32 = vpop.f32.mrf.mxu1  ;;  %v2197_v17 = vadd.f32 %v5358_v19, %v2170_v25  ;;  %v1681_v51 = vrot.slane %v1515_v40, 1  ;;  %v1507_v54 = vadd.f32 %v3947_v33, %v1506_v18  ;;  %v1676_v2 = vsel %vm5827_vm11, %v1673_v0, %v1675_v27 }
 0x1d6   : > { %v2216_v24 = vmax.f32 %v2196_v55, 0.0  ;;  %v4114_v63 = vpop.f32.mrf.mxu0  ;;  %v2152_v31 = vsel %vm5322_vm13, 0.0, %v1676_v2  ;;  %v3965_v14 = vadd.f32 %v3964_v32, %v3963_v48  ;;  %v3959_v0 = vadd.f32 %v5316_v38, %v5305_v62 }
 0x1d7   : > { %v3966_v34 = vpop.f32.mrf.mxu1  ;;  %v2217_v47 = vmax.f32 %v2197_v17, 0.0  ;;  %v1677_v39 = vrot.slane %v1507_v54, 1  ;;  %v2172_v35 = vadd.f32 %v2152_v31, %v2072_v46  ;;  %v1682_v52 = vsel %vm5827_vm11, %v1679_v21, %v1681_v51 }
 0x1d8   : > { %v2243_v42 = vmul.f32 %v2242_v26, %v2216_v24  ;;  %v1528_v58 = vadd.f32 %v4114_v63, %v3962_v28  ;;  %v1519_v15 = vpop.f32.mrf.mxu0  ;;  %v2218_v53 = vmax.f32 %v2198_v10, 0.0  ;;  %v2175_v55 = vadd.f32 %v5157_v7, %v1682_v52 }
 0x1d9   : > { %v3967_v3 = vpop.f32.mrf.mxu1  ;;  %v2244_v41 = vmul.f32 %v2242_v26, %v2217_v47  ;;  %v1678_v30 = vsel %vm5827_vm11, %v1675_v27, %v1677_v39  ;;  %v1680_v48 = vsel %vm5827_vm11, %v1677_v39, %v1679_v21  ;;  %v2199_v46 = vadd.f32 %v5358_v19, %v2172_v35 }
 0x1da   : > { %v2154_v33 = vsel %vm5333_vm14, 0.0, %v1680_v48  ;;  %v2173_v25 = vadd.f32 %v5133_v1, %v1678_v30  ;;  %v4115_v40 = vpop.f32.mrf.mxu0  ;;  %v1520_v32 = vadd.f32 %v3956_v56, %v1519_v15  ;;  %v1687_v26 = vrot.slane %v1528_v58, 1  ;;  %v4478_v30 = vld [vmem:[#allocation8 + $0x218] ss:$12 sps:$4 sm:$0xff]  }
 0x1db   : > { %v3969_v57 = vpop.f32.mrf.mxu1  ;;  %v2174_v28 = vadd.f32 %v2154_v33, %v2074_v49  ;;  %v5387_v62 = vadd.f32 %v4115_v40, %v3965_v14  ;;  %v2219_v17 = vmax.f32 %v2199_v46, 0.0  ;;  %v5390_v54 = vpack.c.bf16 %v2244_v41, %v2243_v42  ;;  %v4469_v41 = vld [vmem:[#allocation8 + $0x158] ss:$12 sps:$4 sm:$0xff]  }
 0x1dc   : > { %v2200_v38 = vadd.f32 %v5358_v19, %v2173_v25  ;;  %v1522_v18 = vpop.f32.mrf.mxu0  ;;  %v3968_v24 = vadd.f32 %v3967_v3, %v3966_v34  ;;  %v1683_v1 = vrot.slane %v1520_v32, 1  ;;  %v1844_v47 = vand.u32 15, %v5343_v61  ;;  %v4479_v32 = vld [vmem:[#allocation8 + $0x200] ss:$12 sps:$4 sm:$0xff]  }
 0x1dd   : > { %v3970_v27 = vpop.f32.mrf.mxu1  ;;  %v2201_v10 = vadd.f32 %v5358_v19, %v2174_v28  ;;  %v1689_v21 = vrot.slane %v5387_v62, 1  ;;  %v1523_v7 = vadd.f32 %v3959_v0, %v1522_v18  ;;  %v5394_v63 = vpack.c.bf16 %v2219_v17, %v2218_v53 }
 0x1de   : > { %v2220_v2 = vmax.f32 %v2200_v38, 0.0  ;;  %v4118_v56 = vpop.f32.mrf.mxu0  ;;  %v1684_v14 = vsel %vm5827_vm11, %v1681_v51, %v1683_v1  ;;  %v5887_v39 = vmov 0  ;;  %v5405_v34 = vadd.s32 120, %v5058_v8 }
 0x1df   : > { %v3972_v49 = vpop.f32.mrf.mxu1  ;;  %v2221_v31 = vmax.f32 %v2201_v10, 0.0  ;;  %v5888_v39 = vsel %vm5400_vm10, 4294967295, %v5887_v39  ;;  %v2202_v42 = vadd.f32 %v5358_v19, %v2175_v55  ;;  %v2156_v35 = vsel %vm5365_vm15, 0.0, %v1684_v14  ;;  %2770 = vmatprep.mubr.bf16.mxu1 %v5394_v63 }
 0x1e0   : > { %v1690_v52 = vsel %vm5827_vm11, %v1687_v26, %v1689_v21  ;;  %v1685_v61 = vrot.slane %v1523_v7, 1  ;;  %v1535_v58 = vpop.f32.mrf.mxu0  ;;  %v2176_v3 = vadd.f32 %v2156_v35, %v5164_v9  ;;  %2771 = vmatmul.mubr.bf16.vlgmr.msra.gmra.mxu1 %v5390_v54  ;;  %v3971_v48 = vadd.f32 %v3970_v27, %v3969_v57  ;;  %v4471_v7 = vld [vmem:[#allocation8 + $0x140] ss:$12 sps:$4 sm:$0xff]  }
 0x1e1   : > { %v3973_v51 = vpop.f32.mrf.mxu1  ;;  %v5412_v45 = vpack.c.bf16 %v2221_v31, %v2220_v2  ;;  %v5415_v0 = vadd.f32 %v3968_v24, %v1535_v58  ;;  %vm5420_vm0 = vcmp.eq.s32.totalorder %v1844_v47, 15  ;;  %v5889_v40 = vmov 0  ;;  %4125 = vmatpush3.bf16.msra.mxu1 %v5092_v37 }
 0x1e2   : > { %v3974_v15 = vadd.f32 %v3973_v51, %v3972_v49  ;;  %v1686_v53 = vsel %vm5827_vm11, %v1683_v1, %v1685_v61  ;;  %v1688_v46 = vsel %vm5827_vm11, %v1685_v61, %v1687_v26  ;;  %v4119_v25 = vpop.f32.mrf.mxu0  ;;  %v5890_v40 = vsel %vm5420_vm0, 4294967295, %v5889_v40  ;;  %4126 = vmatprep.subr.bf16.mxu1 %v4478_v30 }
 0x1e3   : > { %v3975_v33 = vpop.f32.mrf.mxu1  ;;  %v2203_v9 = vadd.f32 %v5358_v19, %v2176_v3  ;;  %v2158_v55 = vsel %vm5374_vm9, 0.0, %v1688_v46  ;;  %v2177_v28 = vadd.f32 %v5182_v16, %v1686_v53  ;;  %2780 = vmatprep.mubr.bf16.mxu1 %v5412_v45  ;;  %2884 = vmatmul.mubr.bf16.vlgmr.msra.gmra.mxu0 %v5412_v45  ;;  %v2179_v62 = vadd.f32 %v5207_v36, %v1690_v52  ;;  %v4470_v16 = vld [vmem:[#allocation8 + $0x98] ss:$12 sps:$4 sm:$0xff]   ;;  %v4472_v3 = vld [vmem:[#allocation8 + $0x80] ss:$12 sps:$4 sm:$0xff]  }
 0x1e4   : > { %v1544_v57 = vadd.f32 %v4118_v56, %v3974_v15  ;;  %v2178_v38 = vadd.f32 %v2158_v55, %v5189_v22  ;;  %v1691_v26 = vrot.slane %v5415_v0, 1  ;;  %v1538_v27 = vpop.f32.mrf.mxu0  ;;  %4009 = vmatpush3.bf16.msra.mxu0 %v4468_v60  ;;  %v1858_v18 = vand.u32 15, %v5405_v34 }
 0x1e5   : > { %v3976_v37 = vpop.f32.mrf.mxu1  ;;  %v5891_v17 = vmov 0   ;;  %v2222_v10 = vmax.f32 %v2202_v42, 0.0  ;;  %v2223_v24 = vmax.f32 %v2203_v9, 0.0  ;;  %v2204_v1 = vadd.f32 %v5358_v19, %v2177_v28  ;;  %4010 = vmatprep.subr.bf16.mxu0 %v4469_v41  ;;  %4127 = vmatpush3.bf16.msra.mxu1 %v4478_v30  ;;  %v4473_v30 = vld [vmem:[#allocation8 + $0x128] ss:$12 sps:$4 sm:$0xff]  }
 0x1e6   : > { %2893 = vmatprep.mubr.bf16.mxu0 %v5891_v17  ;;  %v3977_v2 = vadd.f32 %v3976_v37, %v3975_v33  ;;  %v2205_v22 = vadd.f32 %v5358_v19, %v2178_v38  ;;  %v1695_v36 = vrot.slane %v1544_v57, 1  ;;  %v1692_v49 = vsel %vm5827_vm11, %v1689_v21, %v1691_v26  ;;  %v5439_v31 = vpop.f32.mrf.mxu0  ;;  %4128 = vmatprep.subr.bf16.mxu1 %v4479_v32 }
 0x1e7   : > { %v1539_v56 = vadd.f32 %v3971_v48, %v1538_v27  ;;  %v3978_v47 = vpop.f32.mrf.mxu1  ;;  %v5441_v14 = vpack.c.bf16 %v2223_v24, %v2222_v10  ;;  %v2224_v34 = vmax.f32 %v2204_v1, 0.0  ;;  %v2160_v42 = vsel %vm5400_vm10, 0.0, %v1692_v49  ;;  %v4482_v48 = vld [vmem:[#allocation8 + $0x1e8] ss:$12 sps:$4 sm:$0xff]   ;;  %v4483_v1 = vld [vmem:[#allocation8 + $0x1d0] ss:$12 sps:$4 sm:$0xff]  }
 0x1e8   : > { %v1547_v35 = vadd.f32 %v4119_v25, %v3977_v2  ;;  %v2206_v52 = vadd.f32 %v5358_v19, %v2179_v62  ;;  %v2225_v61 = vmax.f32 %v2205_v22, 0.0  ;;  %v2180_v51 = vadd.f32 %v2160_v42, %v5214_v43  ;;  %v1551_v60 = vpop.f32.mrf.mxu0  ;;  %4011 = vmatpush3.bf16.msra.mxu0 %v4470_v16  ;;  %2781 = vmatmul.mubr.bf16.gmra.mxu1 %v5394_v63  ;;  %v4474_v24 = vld [vmem:[#allocation8 + $0x68] ss:$12 sps:$4 sm:$0xff]   ;;  %v4476_v22 = vld [vmem:[#allocation8 + $0x110] ss:$12 sps:$4 sm:$0xff]  }
 0x1e9   : > { %v1693_v58 = vrot.slane %v1539_v56, 1  ;;  %v3979_v21 = vpop.f32.mrf.mxu1  ;;  %v5449_v41 = vadd.s32 136, %v5058_v8  ;;  %4012 = vmatprep.subr.bf16.mxu0 %v4471_v7  ;;  %2790 = vmatprep.mubr.bf16.mxu1 %v5441_v14  ;;  %v5892_v7 = vmov 0 }
 0x1ea   : > { %v1697_v15 = vrot.slane %v1547_v35, 1  ;;  %v3980_v0 = vadd.f32 %v3979_v21, %v3978_v47  ;;  %v5451_v53 = vpack.c.bf16 %v2225_v61, %v2224_v34  ;;  %v2207_v46 = vadd.f32 %v5358_v19, %v2180_v51  ;;  %v5457_v9 = vpop.f32.mrf.mxu0  ;;  %4129 = vmatpush3.bf16.msra.mxu1 %v4479_v32  ;;  %v4477_v51 = vld [vmem:[#allocation8 + $0x50] ss:$12 sps:$4 sm:$0xff]  }
 0x1eb   : > { %v1694_v43 = vsel %vm5827_vm11, %v1691_v26, %v1693_v58  ;;  %v1696_v33 = vsel %vm5827_vm11, %v1693_v58, %v1695_v36  ;;  %v3981_v25 = vpop.f32.mrf.mxu1  ;;  %2894 = vmatmul.mubr.bf16.gmra.mxu0 %v5441_v14  ;;  %v2226_v38 = vmax.f32 %v2206_v52, 0.0  ;;  %4130 = vmatprep.subr.bf16.mxu1 %v4482_v48  ;;  %v1872_v34 = vand.u32 15, %v5449_v41 }
 0x1ec   : > { %v1698_v55 = vsel %vm5827_vm11, %v1695_v36, %v1697_v15  ;;  %v2162_v28 = vsel %vm5420_vm0, 0.0, %v1696_v33  ;;  %v2181_v57 = vadd.f32 %v5232_v59, %v1694_v43  ;;  %v1552_v62 = vadd.f32 %v3980_v0, %v1551_v60  ;;  %v1554_v10 = vpop.f32.mrf.mxu0  ;;  %2903 = vmatprep.mubr.bf16.mxu0 %v5891_v17  ;;  %4013 = vmatpush3.bf16.msra.mxu0 %v4472_v3  ;;  %v4480_v3 = vld [vmem:[#allocation8 + $0xf8] ss:$12 sps:$4 sm:$0xff]  }
 0x1ed   : > { %v2227_v26 = vmax.f32 %v2207_v46, 0.0  ;;  %v2183_v37 = vadd.f32 %v5255_v13, %v1698_v55  ;;  %v2182_v27 = vadd.f32 %v2162_v28, %v5239_v11  ;;  %v3982_v16 = vpop.f32.mrf.mxu1  ;;  %vm5468_vm11 = vcmp.eq.s32.totalorder %v1858_v18, 15  ;;  %4014 = vmatprep.subr.bf16.mxu0 %v4473_v30  ;;  %v4487_v55 = vld [vmem:[#allocation8 + $0x1a0] ss:$12 sps:$4 sm:$0xff]  }
 0x1ee   : > { %v2208_v2 = vadd.f32 %v5358_v19, %v2181_v57  ;;  %v1699_v59 = vrot.slane %v1552_v62, 1  ;;  %v5893_v7 = vsel %vm5468_vm11, 4294967295, %v5892_v7  ;;  %v3983_v32 = vadd.f32 %v3982_v16, %v3981_v25  ;;  %4131 = vmatpush3.bf16.msra.mxu1 %v4482_v48  ;;  %v4481_v25 = vld [vmem:[#allocation8 + $0x38] ss:$12 sps:$4 sm:$0xff]  }
 0x1ef   : > { %v5472_v13 = vpack.c.bf16 %v2227_v26, %v2226_v38  ;;  %v2209_v11 = vadd.f32 %v5358_v19, %v2182_v27  ;;  %v3984_v36 = vpop.f32.mrf.mxu1  ;;  %vm5894_vm0 = vcmask 1046528   ;;  %v2210_v18 = vadd.f32 %v5358_v19, %v2183_v37  ;;  %4132 = vmatprep.subr.bf16.mxu1 %v4483_v1  ;;  %v4484_v38 = vld [vmem:[#allocation8 + $0xe0] ss:$12 sps:$4 sm:$0xff]  }
 0x1f0   : > { %v2228_v49 = vmax.f32 %v2208_v2, 0.0  ;;  %v1700_v56 = vsel %vm5894_vm0, %v1697_v15, %v1699_v59  ;;  %v1555_v47 = vadd.f32 %v3983_v32, %v1554_v10  ;;  %v1748_v61 = vadd.s32 152, %v5058_v8  ;;  %4015 = vmatpush3.bf16.msra.mxu0 %v4474_v24  ;;  %2791 = vmatmul.mubr.bf16.gmra.mxu1 %v5412_v45  ;;  %v4486_v15 = vld [vmem:[#allocation8 + $0x1b8] ss:$12 sps:$4 sm:$0xff]  }
 0x1f1   : > { %v2229_v42 = vmax.f32 %v2209_v11, 0.0  ;;  %v2164_v35 = vsel %vm5468_vm11, 0.0, %v1700_v56  ;;  %v3985_v52 = vpop.f32.mrf.mxu1  ;;  %4016 = vmatprep.subr.bf16.mxu0 %v4476_v22  ;;  %2800 = vmatprep.mubr.bf16.mxu1 %v5451_v53  ;;  %vm5489_vm11 = vcmp.eq.s32.totalorder %v1872_v34, 15  ;;  %v2230_v46 = vmax.f32 %v2210_v18, 0.0 }
 0x1f2   : > { %v2184_v58 = vadd.f32 %v2164_v35, %v5262_v44  ;;  %v1701_v21 = vrot.slane %v1555_v47, 1  ;;  %v3986_v60 = vadd.f32 %v3985_v52, %v3984_v36  ;;  %4133 = vmatpush3.bf16.msra.mxu1 %v4483_v1  ;;  %v1886_v33 = vand.u32 15, %v1748_v61  ;;  %v5900_v47 = vld [vmem:[#allocation27_spill] sm:$0xff] }
 0x1f3   : > { %v5483_v0 = vpack.c.bf16 %v2229_v42, %v2228_v49  ;;  %v3987_v41 = vpop.f32.mrf.mxu1  ;;  %2904 = vmatmul.mubr.bf16.gmra.mxu0 %v5451_v53  ;;  %4134 = vmatprep.subr.bf16.mxu1 %v4486_v15  ;;  %v4489_v49 = vld [vmem:[#allocation8 + $0x8] ss:$12 sps:$4 sm:$0xff]   ;;  %v2245_v61 = vstv %s2241_s13  ;;  %s4571_s13 = scalar_lea.vmem %s5734_s8, 2048 }
 0x1f4   : > { %v2211_v8 = vadd.f32 %v5358_v19, %v2184_v58  ;;  %v1702_v30 = vsel %vm5894_vm0, %v1699_v59, %v1701_v21  ;;  %v1560_v48 = vadd.f32 %v5439_v31, %v3986_v60  ;;  %2913 = vmatprep.mubr.bf16.mxu0 %v5891_v17  ;;  %4017 = vmatpush3.bf16.msra.mxu0 %v4477_v51  ;;  %vm5509_vm10 = vcmp.eq.s32.totalorder %v1886_v33, 15  ;;  %v4490_v59 = vld [vmem:[#allocation8 + $0x188] ss:$12 sps:$4 sm:$0xff]   ;;  %p4572_p12 = scmp.ne.s32.totalorder %s5734_s8, %s4571_s13 }
 0x1f5   : > { %v3988_v43 = vpop.f32.mrf.mxu1  ;;  %v2185_v31 = vadd.f32 %v5274_v20, %v1702_v30  ;;  %4018 = vmatprep.subr.bf16.mxu0 %v4480_v3  ;;  %v4485_v20 = vld [vmem:[#allocation8 + $0x20] ss:$12 sps:$4 sm:$0xff]  }
 0x1f6   : > { %v2231_v28 = vmax.f32 %v2211_v8, 0.0  ;;  %v1703_v57 = vrot.slane %v1560_v48, 1  ;;  %v3989_v62 = vadd.f32 %v3988_v43, %v3987_v41  ;;  %4135 = vmatpush3.bf16.msra.mxu1 %v4486_v15  ;;  %p4573_p4 = pnand %p4572_p12, %p5946_p2 }
 0x1f7   : > { %4136 = vmatprep.subr.bf16.mxu1 %v4487_v55  ;;  %v2212_v10 = vadd.f32 %v5358_v19, %v2185_v31 }
 0x1f8   : > { %v5497_v26 = vpack.c.bf16 %v2231_v28, %v2230_v46  ;;  %v1704_v37 = vsel %vm5894_vm0, %v1701_v21, %v1703_v57  ;;  %v1563_v27 = vadd.f32 %v5457_v9, %v3989_v62  ;;  %4019 = vmatpush3.bf16.msra.mxu0 %v4481_v25  ;;  %2801 = vmatmul.mubr.bf16.gmra.mxu1 %v5441_v14  ;;  %v4488_v9 = vld [vmem:[#allocation8 + $0xc8] ss:$12 sps:$4 sm:$0xff]   ;;  %p4574_p6 = pneg %p4573_p4 }
 0x1f9   : > { %v2166_v16 = vsel %vm5489_vm11, 0.0, %v1704_v37  ;;  %4020 = vmatprep.subr.bf16.mxu0 %v4484_v38  ;;  %2810 = vmatprep.mubr.bf16.mxu1 %v5472_v13  ;;  %vm5899_vm11 = vmmov %vm5894_vm0  ;;  %v2232_v56 = vmax.f32 %v2212_v10, 0.0 }
 0x1fa   : > { %v2186_v24 = vadd.f32 %v2166_v16, %v5279_v29  ;;  %v1705_v1 = vrot.slane %v1563_v27, 1  ;;  %4137 = vmatpush3.bf16.msra.mxu1 %v4487_v55 }
 0x1fb   : > { %2914 = vmatmul.mubr.bf16.gmra.mxu0 %v5472_v13  ;;  %4138 = vmatprep.subr.bf16.mxu1 %v4490_v59 }
 0x1fc   : > { %v1706_v32 = vsel %vm5899_vm11, %v1703_v57, %v1705_v1  ;;  %v1727_v22 = vsel %vm5894_vm0, %v1705_v1, 0.0  ;;  %v2213_v29 = vadd.f32 %v5358_v19, %v2186_v24  ;;  %2923 = vmatprep.mubr.bf16.mxu0 %v5891_v17  ;;  %4021 = vmatpush3.bf16.msra.mxu0 %v4485_v20 }
 0x1fd   : > { %v2168_v11 = vsel %vm5509_vm10, 0.0, %v1727_v22  ;;  %v2187_v36 = vadd.f32 %v5287_v4, %v1706_v32  ;;  %4022 = vmatprep.subr.bf16.mxu0 %v4488_v9  ;;  %vm5901_vm10 = vcmask 1040384  }
 0x1fe   : > { %v2188_v34 = vadd.f32 %v2168_v11, %v5900_v47  ;;  %v2233_v18 = vmax.f32 %v2213_v29, 0.0  ;;  %4139 = vmatpush3.bf16.msra.mxu1 %v4490_v59  ;;  %vm5903_vm11 = vmmov %vm5901_vm10 }
 0x1ff   : > { %v2214_v42 = vadd.f32 %v5358_v19, %v2187_v36 }
 0x200   : > { %v2256_v35 = vpack.c.bf16 %v2233_v18, %v2232_v56  ;;  %v2215_v52 = vadd.f32 %v5358_v19, %v2188_v34  ;;  %4023 = vmatpush3.bf16.msra.mxu0 %v4489_v49  ;;  %2811 = vmatmul.mubr.bf16.gmra.mxu1 %v5451_v53 }
 0x201   : > { %v2234_v51 = vmax.f32 %v2214_v42, 0.0  ;;  %2820 = vmatprep.mubr.bf16.mxu1 %v5483_v0 }
 0x202   : > { %v2235_v4 = vmax.f32 %v2215_v52, 0.0 }
 0x203   : > { %v2246_v58 = vmul.f32 %v2245_v61, %v2234_v51  ;;  %2924 = vmatmul.mubr.bf16.gmra.mxu0 %v5483_v0 }
 0x204   : > { %v2247_v21 = vmul.f32 %v2245_v61, %v2235_v4  ;;  %2933 = vmatprep.mubr.bf16.mxu0 %v5891_v17 }
 0x206   : > { %v2257_v60 = vpack.c.bf16 %v2247_v21, %v2246_v58 }
 0x208   : > { %2821 = vmatmul.mubr.bf16.gmra.mxu1 %v5472_v13 }
 0x209   : > { %2830 = vmatprep.mubr.bf16.mxu1 %v5497_v26 }
 0x20b   : > { %2934 = vmatmul.mubr.bf16.gmra.mxu0 %v5497_v26 }
 0x20c   : > { %2943 = vmatprep.mubr.bf16.mxu0 %v5891_v17 }
 0x210   : > { %2831 = vmatmul.mubr.bf16.gmra.mxu1 %v5483_v0 }
 0x211   : > { %2840 = vmatprep.mubr.bf16.mxu1 %v2256_v35 }
 0x213   : > { %2944 = vmatmul.mubr.bf16.gmra.mxu0 %v2256_v35 }
 0x214   : > { %2953 = vmatprep.mubr.bf16.mxu0 %v5891_v17 }
 0x218   : > { %2841 = vmatmul.mubr.bf16.gmra.mxu1 %v5497_v26 }
 0x219   : > { %4140 = vmatprep.mubr.bf16.mxu1 %v5412_v45 }
 0x21b   : > { %2954 = vmatmul.mubr.bf16.gmra.mxu0 %v2257_v60 }
 0x21c   : > { %2996 = vmatprep.mubr.bf16.mxu0 %v5394_v63 }
 0x220   : > { %4141 = vmatmul.mubr.bf16.vlgmr.msra.gmra.mxu1 %v5441_v14 }
 0x221   : > { %4144 = vmatprep.mubr.bf16.mxu1 %v5451_v53 }
 0x223   : > { %2997 = vmatmul.mubr.bf16.vlgmr.msra.gmra.mxu0 %v5390_v54 }
 0x224   : > { %3004 = vmatprep.mubr.bf16.mxu0 %v5412_v45 }
 0x228   : > { %4145 = vmatmul.mubr.bf16.gmra.mxu1 %v5472_v13 }
 0x229   : > { %4148 = vmatprep.mubr.bf16.mxu1 %v5483_v0 }
 0x22b   : > { %3005 = vmatmul.mubr.bf16.gmra.mxu0 %v5394_v63 }
 0x22c   : > { %3012 = vmatprep.mubr.bf16.mxu0 %v5441_v14 }
 0x230   : > { %4149 = vmatmul.mubr.bf16.gmra.mxu1 %v5497_v26 }
 0x231   : > { %4152 = vmatprep.mubr.bf16.mxu1 %v2256_v35 }
 0x233   : > { %3013 = vmatmul.mubr.bf16.gmra.mxu0 %v5412_v45 }
 0x234   : > { %3020 = vmatprep.mubr.bf16.mxu0 %v5451_v53 }
 0x238   : > { %4153 = vmatmul.mubr.bf16.gmra.mxu1 %v2257_v60 }
 0x23b   : > { %3021 = vmatmul.mubr.bf16.gmra.mxu0 %v5441_v14 }
 0x23c   : > { %3028 = vmatprep.mubr.bf16.mxu0 %v5472_v13 }
 0x243   : > { %3029 = vmatmul.mubr.bf16.gmra.mxu0 %v5451_v53 }
 0x244   : > { %3036 = vmatprep.mubr.bf16.mxu0 %v5483_v0 }
 0x24b   : > { %3037 = vmatmul.mubr.bf16.gmra.mxu0 %v5472_v13 }
 0x24c   : > { %3044 = vmatprep.mubr.bf16.mxu0 %v5497_v26 }
 0x253   : > { %3045 = vmatmul.mubr.bf16.gmra.mxu0 %v5483_v0 }
 0x254   : > { %3052 = vmatprep.mubr.bf16.mxu0 %v2256_v35 }
 0x25b   : > { %3053 = vmatmul.mubr.bf16.gmra.mxu0 %v5497_v26 }
 0x2a0   : > { %v2772_v19 = vpop.f32.mrf.mxu1 }
 0x2a2   : > { %v2774_v54 = vpop.f32.mrf.mxu1 }
 0x2a3   : > { %v2885_v63 = vpop.f32.mrf.mxu0 }
 0x2a4   : > { %v2886_v45 = vadd.f32 %v2885_v63, %v2772_v19  ;;  %v2776_v17 = vpop.f32.mrf.mxu1 }
 0x2a5   : > { %v2887_v14 = vpop.f32.mrf.mxu0 }
 0x2a6   : > { %v3174_v3 = vrot.slane %v2886_v45, 7  ;;  %v2888_v15 = vadd.f32 %v2887_v14, %v2774_v54  ;;  %v2778_v53 = vpop.f32.mrf.mxu1 }
 0x2a7   : > { %v2889_v41 = vpop.f32.mrf.mxu0 }
 0x2a8   : > { %v3221_v8 = vsel %vm5901_vm10, 0.0, %v3174_v3  ;;  %v2890_v13 = vadd.f32 %v2889_v41, %v2776_v17  ;;  %v2782_v0 = vpop.f32.mrf.mxu1 }
 0x2a9   : > { %v3286_v48 = vsel %vm5069_vm1, 0.0, %v3221_v8  ;;  %v2891_v44 = vpop.f32.mrf.mxu0  ;;  %vm5904_vm1 = vmmov %vm5901_vm10 }
 0x2aa   : > { %v5562_v46 = vadd.f32 %v3286_v48, %v2888_v15  ;;  %v3175_v43 = vrot.slane %v2890_v13, 7  ;;  %v2892_v33 = vadd.f32 %v2891_v44, %v2778_v53  ;;  %v2784_v25 = vpop.f32.mrf.mxu1  ;;  %vm5906_vm0 = vmmov %vm5904_vm1 }
 0x2ab   : > { %v2895_v55 = vpop.f32.mrf.mxu0  ;;  %vm5909_vm10 = vmmov %vm5906_vm0 }
 0x2ac   : > { %v3176_v28 = vsel %vm5903_vm11, %v3174_v3, %v3175_v43  ;;  %v2896_v31 = vadd.f32 %v2895_v55, %v2782_v0  ;;  %v2786_v62 = vpop.f32.mrf.mxu1  ;;  %vm5912_vm11 = vmmov %vm5906_vm0 }
 0x2ad   : > { %v5565_v57 = vadd.f32 %v3176_v28, %v2892_v33  ;;  %v2897_v38 = vpop.f32.mrf.mxu0 }
 0x2ae   : > { %v3177_v26 = vrot.slane %v2896_v31, 7  ;;  %v2898_v37 = vadd.f32 %v2897_v38, %v2784_v25  ;;  %v2788_v27 = vpop.f32.mrf.mxu1 }
 0x2af   : > { %v2899_v16 = vpop.f32.mrf.mxu0 }
 0x2b0   : > { %v3178_v20 = vsel %vm5904_vm1, %v3175_v43, %v3177_v26  ;;  %v2900_v10 = vadd.f32 %v2899_v16, %v2786_v62  ;;  %v2792_v2 = vpop.f32.mrf.mxu1  ;;  %vm5915_vm1 = vmmov %vm5906_vm0 }
 0x2b1   : > { %v3288_v1 = vsel %vm5094_vm2, 0.0, %v3178_v20  ;;  %v2901_v9 = vpop.f32.mrf.mxu0  ;;  %vm5907_vm2 = vmmov %vm5906_vm0 }
 0x2b2   : > { %v5570_v59 = vadd.f32 %v3288_v1, %v2898_v37  ;;  %v3179_v32 = vrot.slane %v2900_v10, 7  ;;  %v2902_v22 = vadd.f32 %v2901_v9, %v2788_v27  ;;  %v2794_v29 = vpop.f32.mrf.mxu1 }
 0x2b3   : > { %v2905_v11 = vpop.f32.mrf.mxu0 }
 0x2b4   : > { %v3180_v36 = vsel %vm5906_vm0, %v3177_v26, %v3179_v32  ;;  %v2906_v49 = vadd.f32 %v2905_v11, %v2792_v2  ;;  %v2796_v47 = vpop.f32.mrf.mxu1 }
 0x2b5   : > { %v5573_v56 = vadd.f32 %v3180_v36, %v2902_v22  ;;  %v2907_v34 = vpop.f32.mrf.mxu0 }
 0x2b6   : > { %v3181_v18 = vrot.slane %v2906_v49, 7  ;;  %v2908_v42 = vadd.f32 %v2907_v34, %v2794_v29  ;;  %v2798_v35 = vpop.f32.mrf.mxu1 }
 0x2b7   : > { %v2909_v52 = vpop.f32.mrf.mxu0 }
 0x2b8   : > { %v3182_v61 = vsel %vm5907_vm2, %v3179_v32, %v3181_v18  ;;  %v2910_v51 = vadd.f32 %v2909_v52, %v2796_v47  ;;  %v2802_v21 = vpop.f32.mrf.mxu1  ;;  %vm5920_vm2 = vmmov %vm5906_vm0 }
 0x2b9   : > { %v3290_v58 = vsel %vm5118_vm3, 0.0, %v3182_v61  ;;  %v2911_v60 = vpop.f32.mrf.mxu0  ;;  %vm5910_vm3 = vmmov %vm5906_vm0 }
 0x2ba   : > { %v5578_v19 = vadd.f32 %v3290_v58, %v2908_v42  ;;  %v3183_v54 = vrot.slane %v2910_v51, 7  ;;  %v2912_v63 = vadd.f32 %v2911_v60, %v2798_v35  ;;  %v2804_v45 = vpop.f32.mrf.mxu1 }
 0x2bb   : > { %v2915_v17 = vpop.f32.mrf.mxu0 }
 0x2bc   : > { %v3184_v14 = vsel %vm5909_vm10, %v3181_v18, %v3183_v54  ;;  %v2916_v3 = vadd.f32 %v2915_v17, %v2802_v21  ;;  %v2806_v53 = vpop.f32.mrf.mxu1  ;;  %vm5923_vm10 = vmmov %vm5906_vm0 }
 0x2bd   : > { %v5581_v15 = vadd.f32 %v3184_v14, %v2912_v63  ;;  %v2917_v41 = vpop.f32.mrf.mxu0 }
 0x2be   : > { %v3185_v8 = vrot.slane %v2916_v3, 7  ;;  %v2918_v13 = vadd.f32 %v2917_v41, %v2804_v45  ;;  %v2808_v30 = vpop.f32.mrf.mxu1 }
 0x2bf   : > { %v2919_v48 = vpop.f32.mrf.mxu0 }
 0x2c0   : > { %v3186_v0 = vsel %vm5910_vm3, %v3183_v54, %v3185_v8  ;;  %v2920_v44 = vadd.f32 %v2919_v48, %v2806_v53  ;;  %v2812_v25 = vpop.f32.mrf.mxu1 }
 0x2c1   : > { %v3292_v33 = vsel %vm5144_vm4, 0.0, %v3186_v0  ;;  %v2921_v55 = vpop.f32.mrf.mxu0  ;;  %vm5913_vm4 = vmmov %vm5906_vm0 }
 0x2c2   : > { %v5586_v28 = vadd.f32 %v3292_v33, %v2918_v13  ;;  %v3187_v31 = vrot.slane %v2920_v44, 7  ;;  %v2922_v62 = vadd.f32 %v2921_v55, %v2808_v30  ;;  %v2814_v38 = vpop.f32.mrf.mxu1 }
 0x2c3   : > { %v2925_v26 = vpop.f32.mrf.mxu0 }
 0x2c4   : > { %v3188_v37 = vsel %vm5912_vm11, %v3185_v8, %v3187_v31  ;;  %v2926_v27 = vadd.f32 %v2925_v26, %v2812_v25  ;;  %v2816_v20 = vpop.f32.mrf.mxu1 }
 0x2c5   : > { %v5589_v16 = vadd.f32 %v3188_v37, %v2922_v62  ;;  %v2927_v10 = vpop.f32.mrf.mxu0 }
 0x2c6   : > { %v3189_v24 = vrot.slane %v2926_v27, 7  ;;  %v2928_v1 = vadd.f32 %v2927_v10, %v2814_v38  ;;  %v2818_v2 = vpop.f32.mrf.mxu1 }
 0x2c7   : > { %v2929_v9 = vpop.f32.mrf.mxu0 }
 0x2c8   : > { %v3190_v32 = vsel %vm5913_vm4, %v3187_v31, %v3189_v24  ;;  %v2930_v22 = vadd.f32 %v2929_v9, %v2816_v20  ;;  %v2822_v36 = vpop.f32.mrf.mxu1 }
 0x2c9   : > { %v3294_v11 = vsel %vm5169_vm5, 0.0, %v3190_v32  ;;  %v2931_v49 = vpop.f32.mrf.mxu0  ;;  %vm5916_vm5 = vmmov %vm5906_vm0 }
 0x2ca   : > { %v5594_v47 = vadd.f32 %v3294_v11, %v2928_v1  ;;  %v3191_v34 = vrot.slane %v2930_v22, 7  ;;  %v2932_v18 = vadd.f32 %v2931_v49, %v2818_v2  ;;  %v2824_v42 = vpop.f32.mrf.mxu1 }
 0x2cb   : > { %v2935_v35 = vpop.f32.mrf.mxu0 }
 0x2cc   : > { %v3192_v52 = vsel %vm5915_vm1, %v3189_v24, %v3191_v34  ;;  %v2936_v61 = vadd.f32 %v2935_v35, %v2822_v36  ;;  %v2826_v4 = vpop.f32.mrf.mxu1 }
 0x2cd   : > { %v5597_v51 = vadd.f32 %v3192_v52, %v2932_v18  ;;  %v2937_v58 = vpop.f32.mrf.mxu0 }
 0x2ce   : > { %v3193_v21 = vrot.slane %v2936_v61, 7  ;;  %v2938_v60 = vadd.f32 %v2937_v58, %v2824_v42  ;;  %v2828_v54 = vpop.f32.mrf.mxu1 }
 0x2cf   : > { %v2939_v63 = vpop.f32.mrf.mxu0 }
 0x2d0   : > { %v3194_v45 = vsel %vm5916_vm5, %v3191_v34, %v3193_v21  ;;  %v2940_v17 = vadd.f32 %v2939_v63, %v2826_v4  ;;  %v2832_v53 = vpop.f32.mrf.mxu1 }
 0x2d1   : > { %v3296_v3 = vsel %vm5194_vm6, 0.0, %v3194_v45  ;;  %v2941_v41 = vpop.f32.mrf.mxu0  ;;  %vm5918_vm6 = vmmov %vm5906_vm0 }
 0x2d2   : > { %v5602_v8 = vadd.f32 %v3296_v3, %v2938_v60  ;;  %v3195_v13 = vrot.slane %v2940_v17, 7  ;;  %v2942_v30 = vadd.f32 %v2941_v41, %v2828_v54  ;;  %v2834_v48 = vpop.f32.mrf.mxu1 }
 0x2d3   : > { %v2945_v0 = vpop.f32.mrf.mxu0 }
 0x2d4   : > { %v3196_v44 = vsel %vm5906_vm0, %v3193_v21, %v3195_v13  ;;  %v2946_v43 = vadd.f32 %v2945_v0, %v2832_v53  ;;  %v2836_v25 = vpop.f32.mrf.mxu1 }
 0x2d5   : > { %v5605_v33 = vadd.f32 %v3196_v44, %v2942_v30  ;;  %v2947_v55 = vpop.f32.mrf.mxu0 }
 0x2d6   : > { %v3197_v31 = vrot.slane %v2946_v43, 7  ;;  %v2948_v62 = vadd.f32 %v2947_v55, %v2834_v48  ;;  %v2838_v38 = vpop.f32.mrf.mxu1 }
 0x2d7   : > { %v2949_v26 = vpop.f32.mrf.mxu0 }
 0x2d8   : > { %v3198_v37 = vsel %vm5918_vm6, %v3195_v13, %v3197_v31  ;;  %v2950_v27 = vadd.f32 %v2949_v26, %v2836_v25  ;;  %v2842_v24 = vpop.f32.mrf.mxu1  ;;  %vm5936_vm6 = vnez %v5888_v39 }
 0x2d9   : > { %v3298_v10 = vsel %vm5219_vm7, 0.0, %v3198_v37  ;;  %v2951_v1 = vpop.f32.mrf.mxu0  ;;  %vm5921_vm7 = vmmov %vm5906_vm0 }
 0x2da   : > { %v5610_v2 = vadd.f32 %v3298_v10, %v2948_v62  ;;  %v3199_v9 = vrot.slane %v2950_v27, 7  ;;  %v2952_v32 = vadd.f32 %v2951_v1, %v2838_v38  ;;  %v2844_v22 = vpop.f32.mrf.mxu1 }
 0x2db   : > { %v2955_v29 = vpop.f32.mrf.mxu0 }
 0x2dc   : > { %v3200_v11 = vsel %vm5920_vm2, %v3197_v31, %v3199_v9  ;;  %v2956_v36 = vadd.f32 %v2955_v29, %v2842_v24  ;;  %v2846_v34 = vpop.f32.mrf.mxu1 }
 0x2dd   : > { %v5613_v49 = vadd.f32 %v3200_v11, %v2952_v32  ;;  %v2957_v18 = vpop.f32.mrf.mxu0  ;;  %v3375_v11 = vld [vmem:[%s5625_s5] sm:$0xff] }
 0x2de   : > { %v3201_v42 = vrot.slane %v2956_v36, 7  ;;  %v2958_v35 = vadd.f32 %v2957_v18, %v2844_v22  ;;  %v2848_v52 = vpop.f32.mrf.mxu1 }
 0x2df   : > { %v2959_v61 = vpop.f32.mrf.mxu0 }
 0x2e0   : > { %v3202_v4 = vsel %vm5921_vm7, %v3199_v9, %v3201_v42  ;;  %v2960_v58 = vadd.f32 %v2959_v61, %v2846_v34  ;;  %v4142_v54 = vpop.f32.mrf.mxu1  ;;  %v5631_v9 = vld [vmem:[%s5804_s4] ss:$0 sm:$0xff] }
 0x2e1   : > { %v3300_v60 = vsel %vm5244_vm8, 0.0, %v3202_v4  ;;  %v2961_v63 = vpop.f32.mrf.mxu0  ;;  %vm5924_vm8 = vcmask 1046528  }
 0x2e2   : > { %v5618_v45 = vadd.f32 %v3300_v60, %v2958_v35  ;;  %v3203_v17 = vrot.slane %v2960_v58, 7  ;;  %v2962_v14 = vadd.f32 %v2961_v63, %v2848_v52  ;;  %v3095_v3 = vpop.f32.mrf.mxu1  ;;  %vm5925_vm3 = vmmov %vm5924_vm8 }
 0x2e3   : > { %v4024_v53 = vpop.f32.mrf.mxu0  ;;  %vm5926_vm11 = vmmov %vm5925_vm3 }
 0x2e4   : > { %v3204_v41 = vsel %vm5923_vm10, %v3201_v42, %v3203_v17  ;;  %v4143_v0 = vpop.f32.mrf.mxu1  ;;  %vm5928_vm4 = vmmov %vm5925_vm3  ;;  %vm5940_vm10 = vnez %v5890_v40 }
 0x2e5   : > { %v5621_v13 = vadd.f32 %v3204_v41, %v2962_v14  ;;  %v4025_v30 = vpop.f32.mrf.mxu0  ;;  %v3376_v14 = vld [vmem:[%s5625_s5 + $0x8] sm:$0xff]  ;;  %vm5930_vm1 = vmmov %vm5925_vm3 }
 0x2e6   : > { %v4026_v48 = vadd.f32 %v4025_v30, %v4024_v53  ;;  %v3098_v31 = vpop.f32.mrf.mxu1  ;;  %vm5932_vm5 = vmmov %vm5930_vm1 }
 0x2e7   : > { %v4027_v44 = vpop.f32.mrf.mxu0  ;;  %vm5934_vm0 = vmmov %vm5930_vm1 }
 0x2e8   : > { %v3096_v25 = vadd.f32 %v4026_v48, %v3095_v3  ;;  %v4146_v10 = vpop.f32.mrf.mxu1  ;;  %vm5937_vm2 = vmmov %vm5934_vm0 }
 0x2e9   : > { %v4028_v43 = vpop.f32.mrf.mxu0  ;;  %vm5939_vm7 = vmmov %vm5934_vm0 }
 0x2ea   : > { %v4029_v55 = vadd.f32 %v4028_v43, %v4027_v44  ;;  %v3238_v37 = vrot.slane %v3096_v25, 1  ;;  %v3111_v42 = vpop.f32.mrf.mxu1  ;;  %v3377_v44 = vld [vmem:[%s5625_s5 + $0x10] sm:$0xff] }
 0x2eb   : > { %v4030_v62 = vpop.f32.mrf.mxu0 }
 0x2ec   : > { %v3099_v38 = vadd.f32 %v4029_v55, %v3098_v31  ;;  %v4147_v17 = vpop.f32.mrf.mxu1 }
 0x2ed   : > { %v4031_v26 = vpop.f32.mrf.mxu0 }
 0x2ee   : > { %v3239_v27 = vrot.slane %v3099_v38, 1  ;;  %v4032_v20 = vadd.f32 %v4031_v26, %v4030_v62  ;;  %v3114_v25 = vpop.f32.mrf.mxu1 }
 0x2ef   : > { %v4033_v24 = vpop.f32.mrf.mxu0 }
 0x2f0   : > { %v3240_v1 = vsel %vm5924_vm8, %v3238_v37, %v3239_v27  ;;  %v3104_v32 = vadd.f32 %v4142_v54, %v4032_v20  ;;  %vm5941_vm8 = vmmov %vm5934_vm0 }
 0x2f1   : > { %v3334_v22 = vadd.f32 %v5562_v46, %v3240_v1  ;;  %v4034_v29 = vpop.f32.mrf.mxu0 }
 0x2f2   : > { %v3241_v36 = vrot.slane %v3104_v32, 1  ;;  %v4035_v34 = vadd.f32 %v4034_v29, %v4033_v24  ;;  %v4150_v32 = vpop.f32.mrf.mxu1  ;;  %v3378_v29 = vld [vmem:[%s5625_s5 + $0x18] sm:$0xff] }
 0x2f3   : > { %v3357_v18 = vadd.f32 %v5631_v9, %v3334_v22  ;;  %v4036_v35 = vpop.f32.mrf.mxu0 }
 0x2f4   : > { %v3242_v52 = vsel %vm5925_vm3, %v3239_v27, %v3241_v36  ;;  %v3107_v61 = vadd.f32 %v4143_v0, %v4035_v34 }
 0x2f5   : > { %v3391_v4 = vadd.f32 %v3375_v11, %v3357_v18  ;;  %v3319_v58 = vsel %vm5318_vm12, 0.0, %v3242_v52  ;;  %v4037_v21 = vpop.f32.mrf.mxu0  ;;  %vm5927_vm12 = vmmov %vm5925_vm3  ;;  %v3379_v52 = vld [vmem:[%s5625_s5 + $0x20] sm:$0xff] }
 0x2f6   : > { %v3335_v46 = vadd.f32 %v3319_v58, %v5565_v57  ;;  %v3243_v60 = vrot.slane %v3107_v61, 1  ;;  %v4038_v54 = vadd.f32 %v4037_v21, %v4036_v35 }
 0x2f7   : > { %v3407_v63 = vmax.f32 %v3391_v4, 0.0  ;;  %v4039_v3 = vpop.f32.mrf.mxu0  ;;  %v3127_v4 = vpop.f32.mrf.mxu1 }
 0x2f8   : > { %v3358_v53 = vadd.f32 %v5631_v9, %v3335_v46  ;;  %v3244_v41 = vsel %vm5926_vm11, %v3241_v36, %v3243_v60  ;;  %v3112_v30 = vadd.f32 %v4038_v54, %v3111_v42  ;;  %vm5943_vm11 = vnez %v5893_v7 }
 0x2f9   : > { %3423 = vst [vmem:[%s4911_s10] sm:$0xff] %v3407_v63  ;;  %v3336_v12 = vadd.f32 %v5570_v59, %v3244_v41  ;;  %v4040_v48 = vpop.f32.mrf.mxu0  ;;  %v4151_v41 = vpop.f32.mrf.mxu1 }
 0x2fa   : > { %v3392_v0 = vadd.f32 %v3376_v14, %v3358_v53  ;;  %v3245_v43 = vrot.slane %v3112_v30, 1  ;;  %v4041_v57 = vadd.f32 %v4040_v48, %v4039_v3 }
 0x2fb   : > { %v3359_v55 = vadd.f32 %v5631_v9, %v3336_v12  ;;  %v4042_v31 = vpop.f32.mrf.mxu0  ;;  %v3380_v12 = vld [vmem:[%s5625_s5 + $0x28] sm:$0xff] }
 0x2fc   : > { %v3408_v62 = vmax.f32 %v3392_v0, 0.0  ;;  %v3246_v38 = vsel %vm5927_vm12, %v3243_v60, %v3245_v43  ;;  %v3115_v26 = vadd.f32 %v4041_v57, %v3114_v25  ;;  %v3381_v25 = vld [vmem:[%s5625_s5 + $0x30] sm:$0xff] }
 0x2fd   : > { %v3393_v37 = vadd.f32 %v3377_v44, %v3359_v55  ;;  %v3321_v27 = vsel %vm5322_vm13, 0.0, %v3246_v38  ;;  %v4043_v59 = vpop.f32.mrf.mxu0  ;;  %vm5929_vm13 = vmmov %vm5925_vm3 }
 0x2fe   : > { %3424 = vst [vmem:[%s4911_s10 + $0x8] sm:$0xff] %v3408_v62  ;;  %v3337_v20 = vadd.f32 %v3321_v27, %v5573_v56  ;;  %v3247_v24 = vrot.slane %v3115_v26, 1  ;;  %v4044_v1 = vadd.f32 %v4043_v59, %v4042_v31  ;;  %v3130_v31 = vpop.f32.mrf.mxu1  ;;  %vm5942_vm3 = vmmov %vm5934_vm0 }
 0x2ff   : > { %v3409_v22 = vmax.f32 %v3393_v37, 0.0  ;;  %v4045_v11 = vpop.f32.mrf.mxu0 }
 0x300   : > { %v3360_v36 = vadd.f32 %v5631_v9, %v3337_v20  ;;  %v3248_v34 = vsel %vm5928_vm4, %v3245_v43, %v3247_v24  ;;  %v3120_v18 = vadd.f32 %v4146_v10, %v4044_v1 }
 0x301   : > { %3425 = vst [vmem:[%s4911_s10 + $0x10] sm:$0xff] %v3409_v22  ;;  %v3338_v6 = vadd.f32 %v5578_v19, %v3248_v34  ;;  %v4046_v42 = vpop.f32.mrf.mxu0 }
 0x302   : > { %v3394_v35 = vadd.f32 %v3378_v29, %v3360_v36  ;;  %v3249_v61 = vrot.slane %v3120_v18, 1  ;;  %v4047_v56 = vadd.f32 %v4046_v42, %v4045_v11  ;;  %v4154_v29 = vpop.f32.mrf.mxu1  ;;  %v3382_v36 = vld [vmem:[%s5625_s5 + $0x38] sm:$0xff] }
 0x303   : > { %v3361_v58 = vadd.f32 %v5631_v9, %v3338_v6  ;;  %v4048_v21 = vpop.f32.mrf.mxu0 }
 0x304   : > { %v3410_v46 = vmax.f32 %v3394_v35, 0.0  ;;  %v3250_v60 = vsel %vm5929_vm13, %v3247_v24, %v3249_v61  ;;  %v3123_v54 = vadd.f32 %v4147_v17, %v4047_v56 }
 0x305   : > { %v3395_v10 = vadd.f32 %v3379_v52, %v3361_v58  ;;  %v3323_v63 = vsel %vm5333_vm14, 0.0, %v3250_v60  ;;  %v4049_v19 = vpop.f32.mrf.mxu0  ;;  %vm5931_vm14 = vmmov %vm5930_vm1 }
 0x306   : > { %3426 = vst [vmem:[%s4911_s10 + $0x18] sm:$0xff] %v3410_v46  ;;  %v3339_v14 = vadd.f32 %v3323_v63, %v5581_v15  ;;  %v3251_v3 = vrot.slane %v3123_v54, 1  ;;  %v4050_v53 = vadd.f32 %v4049_v19, %v4048_v21 }
 0x307   : > { %v3411_v30 = vmax.f32 %v3395_v10, 0.0  ;;  %v4051_v48 = vpop.f32.mrf.mxu0 }
 0x308   : > { %v3362_v0 = vadd.f32 %v5631_v9, %v3339_v14  ;;  %v3252_v44 = vsel %vm5930_vm1, %v3249_v61, %v3251_v3  ;;  %v3128_v17 = vadd.f32 %v4050_v53, %v3127_v4  ;;  %v3383_v61 = vld [vmem:[%s5625_s5 + $0x40] sm:$0xff]  ;;  %v3143_v4 = vpop.f32.mrf.mxu1 }
 0x309   : > { %3427 = vst [vmem:[%s4911_s10 + $0x20] sm:$0xff] %v3411_v30  ;;  %v3340_v5 = vadd.f32 %v5586_v28, %v3252_v44  ;;  %v4052_v43 = vpop.f32.mrf.mxu0  ;;  %v3384_v30 = vld [vmem:[%s5625_s5 + $0x48] sm:$0xff] }
 0x30a   : > { %v3396_v57 = vadd.f32 %v3380_v12, %v3362_v0  ;;  %v3253_v55 = vrot.slane %v3128_v17, 1  ;;  %v4053_v15 = vadd.f32 %v4052_v43, %v4051_v48 }
 0x30b   : > { %v3363_v62 = vadd.f32 %v5631_v9, %v3340_v5  ;;  %v4054_v38 = vpop.f32.mrf.mxu0  ;;  %v3385_v5 = vld [vmem:[%s5625_s5 + $0x50] sm:$0xff] }
 0x30c   : > { %v3412_v26 = vmax.f32 %v3396_v57, 0.0  ;;  %v3254_v37 = vsel %vm5931_vm14, %v3251_v3, %v3253_v55  ;;  %v3131_v27 = vadd.f32 %v4053_v15, %v3130_v31  ;;  %v4155_v3 = vpop.f32.mrf.mxu1 }
 0x30d   : > { %v3397_v59 = vadd.f32 %v3381_v25, %v3363_v62  ;;  %v3325_v20 = vsel %vm5365_vm15, 0.0, %v3254_v37  ;;  %v4055_v28 = vpop.f32.mrf.mxu0  ;;  %vm5933_vm15 = vmmov %vm5930_vm1 }
 0x30e   : > { %3428 = vst [vmem:[%s4911_s10 + $0x28] sm:$0xff] %v3412_v26  ;;  %v3341_v24 = vadd.f32 %v3325_v20, %v5589_v16  ;;  %v3255_v1 = vrot.slane %v3131_v27, 1  ;;  %v4056_v22 = vadd.f32 %v4055_v28, %v4054_v38  ;;  %v3146_v57 = vpop.f32.mrf.mxu1  ;;  %v3386_v28 = vld [vmem:[%s5625_s5 + $0x58] sm:$0xff] }
 0x30f   : > { %v3413_v11 = vmax.f32 %v3397_v59, 0.0  ;;  %v4057_v34 = vpop.f32.mrf.mxu0 }
 0x310   : > { %v3364_v18 = vadd.f32 %v5631_v9, %v3341_v24  ;;  %v3256_v6 = vsel %vm5932_vm5, %v3253_v55, %v3255_v1  ;;  %v3136_v42 = vadd.f32 %v4150_v32, %v4056_v22 }
 0x311   : > { %3429 = vst [vmem:[%s4911_s10 + $0x30] sm:$0xff] %v3413_v11  ;;  %v3342_v23 = vadd.f32 %v5594_v47, %v3256_v6  ;;  %v4058_v35 = vpop.f32.mrf.mxu0 }
 0x312   : > { %v3398_v52 = vadd.f32 %v3382_v36, %v3364_v18  ;;  %v3257_v56 = vrot.slane %v3136_v42, 1  ;;  %v4059_v16 = vadd.f32 %v4058_v35, %v4057_v34 }
 0x313   : > { %v3365_v58 = vadd.f32 %v5631_v9, %v3342_v23  ;;  %v4060_v21 = vpop.f32.mrf.mxu0 }
 0x314   : > { %v3414_v46 = vmax.f32 %v3398_v52, 0.0  ;;  %v3258_v60 = vsel %vm5933_vm15, %v3255_v1, %v3257_v56  ;;  %v3139_v54 = vadd.f32 %v4151_v41, %v4059_v16 }
 0x315   : > { %v3399_v32 = vadd.f32 %v3383_v61, %v3365_v58  ;;  %v3327_v10 = vsel %vm5374_vm9, 0.0, %v3258_v60  ;;  %v4061_v47 = vpop.f32.mrf.mxu0  ;;  %vm5935_vm9 = vmmov %vm5934_vm0 }
 0x316   : > { %3430 = vst [vmem:[%s4911_s10 + $0x38] sm:$0xff] %v3414_v46  ;;  %v3343_v63 = vadd.f32 %v3327_v10, %v5597_v51  ;;  %v3259_v19 = vrot.slane %v3139_v54, 1  ;;  %v4062_v14 = vadd.f32 %v4061_v47, %v4060_v21  ;;  %v3390_v47 = vld [vmem:[%s5625_s5 + $0x78] sm:$0xff] }
 0x317   : > { %v3415_v53 = vmax.f32 %v3399_v32, 0.0  ;;  %v4063_v12 = vpop.f32.mrf.mxu0  ;;  %v3389_v32 = vld [vmem:[%s5625_s5 + $0x70] sm:$0xff] }
 0x318   : > { %v3366_v48 = vadd.f32 %v5631_v9, %v3343_v63  ;;  %v3260_v0 = vsel %vm5934_vm0, %v3257_v56, %v3259_v19  ;;  %v3144_v41 = vadd.f32 %v4062_v14, %v3143_v4  ;;  %v3388_v4 = vld [vmem:[%s5625_s5 + $0x68] sm:$0xff] }
 0x319   : > { %3431 = vst [vmem:[%s4911_s10 + $0x40] sm:$0xff] %v3415_v53  ;;  %v3344_v50 = vadd.f32 %v5602_v8, %v3260_v0  ;;  %v4064_v44 = vpop.f32.mrf.mxu0 }
 0x31a   : > { %v3400_v17 = vadd.f32 %v3384_v30, %v3366_v48  ;;  %v3261_v43 = vrot.slane %v3144_v41, 1  ;;  %v4065_v51 = vadd.f32 %v4064_v44, %v4063_v12 }
 0x31b   : > { %v3367_v25 = vadd.f32 %v5631_v9, %v3344_v50  ;;  %v4066_v55 = vpop.f32.mrf.mxu0 }
 0x31c   : > { %v3416_v15 = vmax.f32 %v3400_v17, 0.0  ;;  %v3262_v31 = vsel %vm5935_vm9, %v3259_v19, %v3261_v43  ;;  %v3147_v62 = vadd.f32 %v4065_v51, %v3146_v57 }
 0x31d   : > { %v3401_v38 = vadd.f32 %v3385_v5, %v3367_v25  ;;  %v3329_v26 = vsel %vm5936_vm6, 0.0, %v3262_v31  ;;  %v4067_v8 = vpop.f32.mrf.mxu0 }
 0x31e   : > { %3432 = vst [vmem:[%s4911_s10 + $0x48] sm:$0xff] %v3416_v15  ;;  %v3345_v37 = vadd.f32 %v3329_v26, %v5605_v33  ;;  %v3263_v27 = vrot.slane %v3147_v62, 1  ;;  %v4068_v59 = vadd.f32 %v4067_v8, %v4066_v55  ;;  %v3387_v33 = vld [vmem:[%s5625_s5 + $0x60] sm:$0xff]  ;;  %s4575_s5 = sshll.u32 %s4706_s14, 4  ;;  %s4576_s5 = int_to_ptr.vmem [resolvable:$false] %s4575_s5 }
 0x31f   : > { %v3417_v20 = vmax.f32 %v3401_v38, 0.0  ;;  %v4069_v24 = vpop.f32.mrf.mxu0  ;;  %s4577_s7 = scalar_lea.vmem %s4576_s5, 4096  ;;  %p4578_p5 = scmp.lt.s32.totalorder %s5734_s8, %s4576_s5 }
 0x320   : > { %v3368_v1 = vadd.f32 %v5631_v9, %v3345_v37  ;;  %v3264_v22 = vsel %vm5937_vm2, %v3261_v43, %v3263_v27  ;;  %v3152_v11 = vadd.f32 %v4154_v29, %v4068_v59  ;;  %p4579_p1 = scmp.lt.s32.totalorder %s4577_s7, %s4571_s13 }
 0x321   : > { %3433 = vst [vmem:[%s4911_s10 + $0x50] sm:$0xff] %v3417_v20  ;;  %v3346_v39 = vadd.f32 %v5610_v2, %v3264_v22  ;;  %v4070_v36 = vpop.f32.mrf.mxu0 }
 0x322   : > { %v3402_v34 = vadd.f32 %v3386_v28, %v3368_v1  ;;  %v3265_v18 = vrot.slane %v3152_v11, 1  ;;  %v4071_v6 = vadd.f32 %v4070_v36, %v4069_v24  ;;  %p4580_p7 = por %p4579_p1, %p4578_p5 }
 0x323   : > { %v3369_v42 = vadd.f32 %v5631_v9, %v3346_v39 }
 0x324   : > { %v3418_v23 = vmax.f32 %v3402_v34, 0.0  ;;  %v3266_v35 = vsel %vm5939_vm7, %v3263_v27, %v3265_v18  ;;  %v3155_v52 = vadd.f32 %v4155_v3, %v4071_v6  ;;  %p4581_p9 = pnand %p4580_p7, %p4574_p6 }
 0x325   : > { %v3403_v61 = vadd.f32 %v3387_v33, %v3369_v42  ;;  %v3331_v29 = vsel %vm5940_vm10, 0.0, %v3266_v35 }
 0x326   : > { %3434 = vst [vmem:[%s4911_s10 + $0x58] sm:$0xff] %v3418_v23  ;;  %v3347_v2 = vadd.f32 %v3331_v29, %v5613_v49  ;;  %v3267_v56 = vrot.slane %v3155_v52, 1 }
 0x327   : > { %v3419_v16 = vmax.f32 %v3403_v61, 0.0 }
 0x328   : > { %v3370_v58 = vadd.f32 %v5631_v9, %v3347_v2  ;;  %v3268_v21 = vsel %vm5941_vm8, %v3265_v18, %v3267_v56  ;;  %v3285_v46 = vsel %vm5942_vm3, %v3267_v56, 0.0 }
 0x329   : > { %3435 = vst [vmem:[%s4911_s10 + $0x60] sm:$0xff] %v3419_v16  ;;  %v3333_v40 = vsel %vm5943_vm11, 0.0, %v3285_v46  ;;  %v3348_v49 = vadd.f32 %v5618_v45, %v3268_v21 }
 0x32a   : > { %v3404_v60 = vadd.f32 %v3388_v4, %v3370_v58  ;;  %v3349_v54 = vadd.f32 %v3333_v40, %v5621_v13 }
 0x32b   : > { %v3371_v10 = vadd.f32 %v5631_v9, %v3348_v49 }
 0x32c   : > { %v3420_v63 = vmax.f32 %v3404_v60, 0.0  ;;  %v3372_v19 = vadd.f32 %v5631_v9, %v3349_v54 }
 0x32d   : > { %v3405_v7 = vadd.f32 %v3389_v32, %v3371_v10 }
 0x32e   : > { %3436 = vst [vmem:[%s4911_s10 + $0x68] sm:$0xff] %v3420_v63  ;;  %v3406_v45 = vadd.f32 %v3390_v47, %v3372_v19 }
 0x32f   : > { %v3421_v14 = vmax.f32 %v3405_v7, 0.0 }
 0x330   : > { %v3422_v13 = vmax.f32 %v3406_v45, 0.0 }
 0x331   : > { %3437 = vst [vmem:[%s4911_s10 + $0x70] sm:$0xff] %v3421_v14 }
 0x332   : > { %3438 = vst [vmem:[%s4911_s10 + $0x78] sm:$0xff] %v3422_v13 }
 0x333   : > { %4584 = shalt.err (!%p4581_p9)
}
 0x334   : > { %s4585_s25 = scalar_lea.hbm %s5732_s1, 2048  ;;  %s4589_s21 = scalar_lea.hbm %s5945_s12, 16384 }
 0x335   : > { %p4586_p13 = scmp.ne.s32.totalorder %s5732_s1, %s4585_s25  ;;  %p4590_p11 = scmp.lt.s32.totalorder %s5732_s1, %s5945_s12 }
 0x336   : > { %p4591_p3 = scmp.lt.s32.totalorder %s4589_s21, %s4585_s25 }
 0x337   : > { %p4587_p0 = pnand %p4586_p13, %p5946_p2 }
 0x338   : > { %p4592_p10 = por %p4591_p3, %p4590_p11 }
 0x339   : > { %p4588_p8 = pneg %p4587_p0 }
 0x33b   : > { %p4593_p12 = pnand %p4592_p10, %p4588_p8 }
 0x33d   : > { %4596 = shalt.err (!%p4593_p12)
}
 0x33e   : > { %s4707_s9 = smov 128   ;;  %s4708_s6 = smov 8  }
 0x33f   : > { %4166 = dma.vmem_to_hbm [thread:$0]  (%p5946_p2), %s5734_s8, 2048, %s5732_s1, %s5740_s3, %s4707_s9, %s4707_s9, %s4708_s6  }
 0x340 PF: > { %s5947_s11 = sld [smem:[#allocation13_spill]]  ;;  %p4188_p4 = scmp.ge.s32.totalorder %s4695_s28, 2 }
 0x341   : > { %s5948_s17 = sld [smem:[#allocation17_spill]] }
 0x346   : > { %s3471_s13 = sand.u32 1, %s5947_s11  }
 0x347   : > { %p5949_p6 = scmp.ne.s32.totalorder %s5948_s17, 0  ;;  %s3472_s14 = scalar_lea.sflag [#allocation5], %s3471_s13 }
 0x349   : > { %p4180_p5 = pnand %p4188_p4, %p5949_p6 }
 0x34b   : > { %p4181_p1 = pneg %p4180_p5 }
 0x34d   : > { %4650 = dma.done.wait (%p4181_p1), %s3472_s14, 2048  }
 0x34e   : > { %4652 = vsyncadd (%p4181_p1), %s3472_s14, 4294965248  ;;  %s22_s28 = sadd.s32 1, %s4695_s28   ;;  %s5950_s24 = smov %s4876_s18 }
 0x34f   : > { %p19_p7 = scmp.ge.s32.totalorder %s22_s28, 10   ;;  %s5951_s8 = sld [smem:[#allocation15_spill]] }
 0x350   : > { %s5952_s1 = sld [smem:[#allocation18_spill]]  ;;  %s5953_s18 = smov %s4659_s19 }
 0x351   : > { %s5954_s19 = smov %s4663_s20  ;;  %s5955_s20 = smov %s4881_s26 }
 0x352   : > { %s5956_s21 = smov %s4671_s22  ;;  %s5957_s22 = smov %s4675_s23 }
 0x353   : > { %s5958_s23 = smov %s5950_s24  ;;  %s5960_s25 = smov %s4691_s27 }
 0x354   : > { %s5962_s27 = smov %s5968_s30  ;;  %21 = sbr.rel (!%p19_p7) target bundleno = 14 (0xe), region = 101 }
 0x355   : > { %s5959_s24 = smov %s5951_s8 }
 0x356   : > { %s5961_s26 = smov %s5952_s1 }
 0x359   :  { %3477 = vsyncpa [#allocation4], 1 }
 0x35a   :  { %3479 = vsyncpa [#allocation4 + $0x1], 1 }
 0x35b   :  { %3480 = vsyncpa [#allocation7], 1 }
 0x35c   :  { %3481 = vsyncpa [#allocation5], 1 }
 0x35d   :  { %3483 = vsyncpa [#allocation5 + $0x1], 1 }

</bundles_post_ra>
